<compile_context>
chip_gen: v6e
topology: v6e:2x2x1
jax: 0.10.0
libtpu: 0.0.40
codegen_flags: <defaults>
</compile_context>

<pallas_src>
import functools

import jax
import jax.numpy as jnp
from jax.experimental import pallas as pl
from jax.experimental.pallas import tpu as pltpu


def _round_up(x, m):
    return ((x + m - 1) // m) * m


# -------------- pass A: column sums of tanh(z @ W1_bd + b1) per metapath --------------
def _colsum_kernel(z_ref, w1bd_ref, b1t_ref, acc_ref, *, tn, n_total, need_mask):
    i = pl.program_id(1)                     # reduction ("arbitrary") axis

    @pl.when(i == 0)
    def _init():
        acc_ref[...] = jnp.zeros_like(acc_ref)

    # One block-diagonal matmul over the whole lane-dense tile:
    #   (tn, M*D) bf16 @ (M*D, M*H) bf16 -> (tn, M*H) f32.
    h = jnp.dot(z_ref[...], w1bd_ref[...], preferred_element_type=jnp.float32)
    h = jnp.tanh(h + b1t_ref[...])           # bias-add + tanh in f32 (v5e-safe)

    if need_mask:                            # static branch: zero padded node rows
        c = pl.program_id(0)
        row0 = (c * pl.num_programs(1) + i) * tn
        rows = row0 + jax.lax.broadcasted_iota(jnp.int32, (h.shape[0], 1), 0)
        h = jnp.where(rows < n_total, h, 0.0)

    # Single unmasked full-lane accumulate into the resident (1, 1, M*H) block.
    # (For extreme N, per-tile 1/N pre-scaling would keep this better conditioned.)
    acc_ref[...] += jnp.sum(h, axis=0, keepdims=True)[None]


# --------------------------- pass B: out_tile = z_tile @ B ---------------------------
def _mix_kernel(z_ref, bmat_ref, out_ref):
    out_ref[...] = jnp.dot(
        z_ref[...], bmat_ref[...], preferred_element_type=jnp.float32
    ).astype(out_ref.dtype)


# -------------------------------------- wrapper --------------------------------------
@functools.partial(jax.jit,
                   static_argnames=("block_n", "num_slices", "stream_dtype"))
def semantic_attention(z, w1, b1, w2, *, block_n=2048, num_slices=2,
                       stream_dtype=jnp.bfloat16):
    n, m, d = z.shape
    h = w1.shape[1]
    md, mh = m * d, m * h

    # ---- node tiling: cdiv + zero-pad (bounded VMEM for any N, no whole-array fallback)
    tn = _round_up(max(8, min(block_n, _round_up(n, 8))), 8)
    tiles_total = pl.cdiv(n, tn)
    slices = max(1, min(num_slices, tiles_total))     # v7x: 2 -> megacore shard of pass A
    tiles_per_slice = pl.cdiv(tiles_total, slices)
    n_pad = slices * tiles_per_slice * tn
    need_mask = n_pad != n

    z2d = z.reshape(n, md).astype(stream_dtype)       # lane-dense bf16 streaming view
    if need_mask:
        z2d = jnp.pad(z2d, ((0, n_pad - n), (0, 0)))

    # Weights: block-diagonal W1 and lane-tiled bias (DMA'd once, VMEM-resident).
    w1_bd = jnp.kron(jnp.eye(m, dtype=jnp.float32),
                     w1.astype(jnp.float32)).astype(stream_dtype)        # (M*D, M*H)
    b1_t = jnp.tile(b1.reshape(1, h).astype(jnp.float32), (1, m))        # (1, M*H) f32

    vmem_limit = 32 * 1024 * 1024          # safe on v5e/v6e/v7x at block_n<=4096

    # ---- pass A: per-metapath column sums (per-core partials) ----
    partials = pl.pallas_call(
        functools.partial(_colsum_kernel, tn=tn, n_total=n, need_mask=need_mask),
        out_shape=jax.ShapeDtypeStruct((slices, 1, mh), jnp.float32),
        grid_spec=pltpu.PrefetchScalarGridSpec(
            num_scalar_prefetch=0,
            grid=(slices, tiles_per_slice),
            in_specs=[
                pl.BlockSpec((tn, md),
                             lambda c, i: (c * tiles_per_slice + i, 0)),  # z (streamed)
                pl.BlockSpec((md, mh), lambda c, i: (0, 0)),              # W1_bd (resident)
                pl.BlockSpec((1, mh), lambda c, i: (0, 0)),               # b1 tiled (resident)
            ],
            out_specs=pl.BlockSpec((1, 1, mh), lambda c, i: (c, 0, 0)),   # per-core partial
        ),
        compiler_params=pltpu.CompilerParams(
            dimension_semantics=("parallel", "arbitrary"),
            vmem_limit_bytes=vmem_limit,
        ),
    )(z2d, w1_bd, b1_t)

    # ---- finalize (tiny, exact): w2 projection, mean over N, softmax -> beta ----
    col = partials.reshape(slices, mh).sum(axis=0).reshape(m, h)          # (M, H)
    scores = (col @ w2.astype(jnp.float32)) / jnp.float32(n)              # (M, 1)
    beta = jax.nn.softmax(scores, axis=0)                                 # (M, 1)

    # Beta-scaled stacked identity so pass B is one MXU matmul per tile.
    bmat = (beta.reshape(m, 1, 1)
            * jnp.eye(d, dtype=jnp.float32)[None]).reshape(md, d).astype(stream_dtype)

    # ---- pass B: out[n] = sum_m beta[m] * z[n, m, :]  via  z_tile @ B ----
    out = pl.pallas_call(
        _mix_kernel,
        out_shape=jax.ShapeDtypeStruct((n_pad, d), jnp.float32),
        grid_spec=pltpu.PrefetchScalarGridSpec(
            num_scalar_prefetch=0,
            grid=(n_pad // tn,),
            in_specs=[
                pl.BlockSpec((tn, md), lambda i: (i, 0)),                 # z tile
                pl.BlockSpec((md, d), lambda i: (0, 0)),                  # B (resident)
            ],
            out_specs=pl.BlockSpec((tn, d), lambda i: (i, 0)),
        ),
        compiler_params=pltpu.CompilerParams(
            dimension_semantics=("parallel",),
            vmem_limit_bytes=vmem_limit,
        ),
    )(z2d, bmat)

    return out[:n] if need_mask else out


def reference(z, w1, b1, w2):
    w = jnp.tanh(z @ w1 + b1) @ w2          # (N, M, 1)
    w = w.mean(axis=0)                      # (M, 1)
    beta = jax.nn.softmax(w, axis=0)        # (M, 1)
    beta = jnp.broadcast_to(beta, (z.shape[0],) + beta.shape)
    return (beta * z).sum(axis=1)           # (N, D)


if __name__ == "__main__":
    # M metapaths, in_size D, hidden H (module default hidden=128)
    M, D, H = 4, 32, 128

    key = jax.random.PRNGKey(0)
    kz, kw1, kb1, kw2 = jax.random.split(key, 4)

    w1 = jax.random.normal(kw1, (D, H), jnp.float32) * (1.0 / jnp.sqrt(D))
    b1 = jax.random.normal(kb1, (1, H), jnp.float32) * 0.01
    w2 = jax.random.normal(kw2, (H, 1), jnp.float32) * (1.0 / jnp.sqrt(H))

    # block_n=256 in the demo just to exercise the multi-tile pipeline + the
    # 2-way parallel split; production default is block_n=2048.
    for n_nodes in (1024, 1000):            # divisible case + padded/masked tail case
        z = jax.random.normal(jax.random.fold_in(kz, n_nodes), (n_nodes, M, D),
                              dtype=jnp.float32)
        out = semantic_attention(z, w1, b1, w2, block_n=256, num_slices=2)
        out = jax.block_until_ready(out)

        ref = reference(z, w1, b1, w2)
        assert out.shape == (n_nodes, D)
        err = float(jnp.max(jnp.abs(out - ref)))
        # Tolerance reflects bf16-streamed z / W1 / beta vs an all-f32 reference
        # (softmax itself is exact f32 in the wrapper).
        assert jnp.allclose(out, ref, atol=2e-2, rtol=2e-2), (
            "mismatch vs reference (N=%d), max abs err = %e" % (n_nodes, err))

    print("KERNEL_OK")
</pallas_src>

<mosaic_0001>
module attributes {stable_mosaic.version = 11 : i64} {
  func.func @_colsum_kernel(%arg0: i32, %arg1: i32, %arg2: memref<256x128xbf16, #tpu.memory_space<vmem>>, %arg3: memref<128x512xbf16, #tpu.memory_space<vmem>>, %arg4: memref<1x512xf32, #tpu.memory_space<vmem>>, %arg5: memref<1x1x512xf32, #tpu.memory_space<vmem>>) attributes {dimension_semantics = [#tpu.dimension_semantics<parallel>, #tpu.dimension_semantics<arbitrary>], iteration_bounds = array<i64: 2, 2>, scalar_prefetch = 0 : i64, scratch_operands = 0 : i64, tpu.core_type = #tpu.core_type<tc>, window_params = [{transform_indices = @transform_0, window_bounds = array<i64: 256, 128>}, {pipeline_mode = #tpu.pipeline_mode<synchronous>, transform_indices = @transform_1, window_bounds = array<i64: 128, 512>}, {pipeline_mode = #tpu.pipeline_mode<synchronous>, transform_indices = @transform_2, window_bounds = array<i64: 1, 512>}, {transform_indices = @transform_3, window_bounds = array<i64: 1, 1, 512>}]} {
    %c0_i32 = arith.constant 0 : i32
    %0 = arith.cmpi eq, %arg1, %c0_i32 : i32
    %1 = arith.extui %0 : i1 to i32
    %c0_i32_0 = arith.constant 0 : i32
    %2 = arith.cmpi ne, %1, %c0_i32_0 : i32
    scf.if %2 {
      %cst_13 = arith.constant 0.000000e+00 : f32
      %16 = vector.broadcast %cst_13 : f32 to vector<1x1x512xf32>
      %c0_14 = arith.constant 0 : index
      %c0_15 = arith.constant 0 : index
      %c0_16 = arith.constant 0 : index
      %17 = vector.load %arg5[%c0_14, %c0_15, %c0_16] : memref<1x1x512xf32, #tpu.memory_space<vmem>>, vector<1x1x512xf32>
      tpu.vector_store %arg5[%c0_14, %c0_15, %c0_16], %16 {strides = array<i32>} : memref<1x1x512xf32, #tpu.memory_space<vmem>>, vector<1x1x512xf32>,
    } else {
    }
    %c0 = arith.constant 0 : index
    %c0_1 = arith.constant 0 : index
    %3 = vector.load %arg2[%c0, %c0_1] : memref<256x128xbf16, #tpu.memory_space<vmem>>, vector<256x128xbf16>
    %c0_2 = arith.constant 0 : index
    %c0_3 = arith.constant 0 : index
    %4 = vector.load %arg3[%c0_2, %c0_3] : memref<128x512xbf16, #tpu.memory_space<vmem>>, vector<128x512xbf16>
    %cst = arith.constant dense<0.000000e+00> : vector<256x512xf32>
    %5 = tpu.matmul %3, %4, %cst {dimension_numbers = #tpu.dot_dimension_numbers<[1], [0], [0], [1], [0, 0, 1, 1], [], []>} : vector<256x128xbf16>, vector<128x512xbf16>, vector<256x512xf32> -> vector<256x512xf32>
    %c0_4 = arith.constant 0 : index
    %c0_5 = arith.constant 0 : index
    %6 = vector.load %arg4[%c0_4, %c0_5] : memref<1x512xf32, #tpu.memory_space<vmem>>, vector<1x512xf32>
    %7 = vector.broadcast %6 : vector<1x512xf32> to vector<256x512xf32>
    %8 = arith.addf %5, %7 : vector<256x512xf32>
    %9 = math.tanh %8 : vector<256x512xf32>
    %c0_6 = arith.constant 0 : index
    %c0_7 = arith.constant 0 : index
    %c0_8 = arith.constant 0 : index
    %10 = vector.load %arg5[%c0_6, %c0_7, %c0_8] : memref<1x1x512xf32, #tpu.memory_space<vmem>>, vector<1x1x512xf32>
    %cst_9 = arith.constant dense<0.000000e+00> : vector<512xf32>
    %11 = vector.multi_reduction <add>, %9, %cst_9 [0] : vector<256x512xf32> to vector<512xf32>
    %12 = vector.shape_cast %11 : vector<512xf32> to vector<1x512xf32>
    %13 = vector.shape_cast %12 : vector<1x512xf32> to vector<1x1x512xf32>
    %14 = arith.addf %10, %13 : vector<1x1x512xf32>
    %c0_10 = arith.constant 0 : index
    %c0_11 = arith.constant 0 : index
    %c0_12 = arith.constant 0 : index
    %15 = vector.load %arg5[%c0_10, %c0_11, %c0_12] : memref<1x1x512xf32, #tpu.memory_space<vmem>>, vector<1x1x512xf32>
    tpu.vector_store %arg5[%c0_10, %c0_11, %c0_12], %14 {strides = array<i32>} : memref<1x1x512xf32, #tpu.memory_space<vmem>>, vector<1x1x512xf32>,
    return
  }
  func.func @transform_0(%arg0: i32, %arg1: i32) -> (i32, i32) {
    %c2_i32 = arith.constant 2 : i32
    %0 = arith.muli %arg0, %c2_i32 : i32
    %1 = arith.addi %0, %arg1 : i32
    %c0_i32 = arith.constant 0 : i32
    %c0_i32_0 = arith.constant 0 : i32
    return %1, %c0_i32 : i32, i32
  }
  func.func @transform_1(%arg0: i32, %arg1: i32) -> (i32, i32) {
    %c0_i32 = arith.constant 0 : i32
    %c0_i32_0 = arith.constant 0 : i32
    %c0_i32_1 = arith.constant 0 : i32
    return %c0_i32, %c0_i32_0 : i32, i32
  }
  func.func @transform_2(%arg0: i32, %arg1: i32) -> (i32, i32) {
    %c0_i32 = arith.constant 0 : i32
    %c0_i32_0 = arith.constant 0 : i32
    %c0_i32_1 = arith.constant 0 : i32
    return %c0_i32, %c0_i32_0 : i32, i32
  }
  func.func @transform_3(%arg0: i32, %arg1: i32) -> (i32, i32, i32) {
    %c0_i32 = arith.constant 0 : i32
    %c0_i32_0 = arith.constant 0 : i32
    %c0_i32_1 = arith.constant 0 : i32
    return %arg0, %c0_i32, %c0_i32_0 : i32, i32, i32
  }
}

module attributes {stable_mosaic.version = 11 : i64} {
  func.func @_mix_kernel(%arg0: i32, %arg1: memref<256x128xbf16, #tpu.memory_space<vmem>>, %arg2: memref<128x32xbf16, #tpu.memory_space<vmem>>, %arg3: memref<256x32xf32, #tpu.memory_space<vmem>>) attributes {dimension_semantics = [#tpu.dimension_semantics<parallel>], iteration_bounds = array<i64: 4>, scalar_prefetch = 0 : i64, scratch_operands = 0 : i64, tpu.core_type = #tpu.core_type<tc>, window_params = [{transform_indices = @transform_0, window_bounds = array<i64: 256, 128>}, {pipeline_mode = #tpu.pipeline_mode<synchronous>, transform_indices = @transform_1, window_bounds = array<i64: 128, 32>}, {transform_indices = @transform_2, window_bounds = array<i64: 256, 32>}]} {
    %c0 = arith.constant 0 : index
    %c0_0 = arith.constant 0 : index
    %0 = vector.load %arg1[%c0, %c0_0] : memref<256x128xbf16, #tpu.memory_space<vmem>>, vector<256x128xbf16>
    %c0_1 = arith.constant 0 : index
    %c0_2 = arith.constant 0 : index
    %1 = vector.load %arg2[%c0_1, %c0_2] : memref<128x32xbf16, #tpu.memory_space<vmem>>, vector<128x32xbf16>
    %cst = arith.constant dense<0.000000e+00> : vector<256x32xf32>
    %2 = tpu.matmul %0, %1, %cst {dimension_numbers = #tpu.dot_dimension_numbers<[1], [0], [0], [1], [0, 0, 1, 1], [], []>} : vector<256x128xbf16>, vector<128x32xbf16>, vector<256x32xf32> -> vector<256x32xf32>
    %c0_3 = arith.constant 0 : index
    %c0_4 = arith.constant 0 : index
    %3 = vector.load %arg3[%c0_3, %c0_4] : memref<256x32xf32, #tpu.memory_space<vmem>>, vector<256x32xf32>
    tpu.vector_store %arg3[%c0_3, %c0_4], %2 {strides = array<i32>} : memref<256x32xf32, #tpu.memory_space<vmem>>, vector<256x32xf32>,
    return
  }
  func.func @transform_0(%arg0: i32) -> (i32, i32) {
    %c0_i32 = arith.constant 0 : i32
    %c0_i32_0 = arith.constant 0 : i32
    return %arg0, %c0_i32 : i32, i32
  }
  func.func @transform_1(%arg0: i32) -> (i32, i32) {
    %c0_i32 = arith.constant 0 : i32
    %c0_i32_0 = arith.constant 0 : i32
    %c0_i32_1 = arith.constant 0 : i32
    return %c0_i32, %c0_i32_0 : i32, i32
  }
  func.func @transform_2(%arg0: i32) -> (i32, i32) {
    %c0_i32 = arith.constant 0 : i32
    %c0_i32_0 = arith.constant 0 : i32
    return %arg0, %c0_i32 : i32, i32
  }
}

</mosaic_0001>

<bundles_post_ra>
// kernel: semantic_attention.3
= control target key start
LH: loop header
LB: loop body
LE: loop exit
PB: predicated region body
PF: predicated region fallthrough
CT: control target
= control target key end

     0   :  { %s768_s9 = smov 0   ;;  %s897_s0 = inlined_call_operand.vmem [shape: bf16[1024,128], index: 0, kind: input, shape index: {}]   ;;  %s898_s1 = inlined_call_operand.vmem [shape: bf16[128,32], index: 1, kind: input, shape index: {}]   ;;  %s899_s2 = inlined_call_operand.vmem [shape: f32[1024,32], index: 2, kind: output, shape index: {}]  }
   0x1 LB: > { %s590_s10 = sadd.s32 4294967295, %s751_s9   ;;  %p594_p0 = scmp.ge.s32.totalorder %s751_s9, 1  ;;  %s751_s9 = sphi %s768_s9, %s12_s9  }
   0x2   : > { %p113_p1 = scmp.lt.s32.totalorder %s751_s9, 5 }
   0x4   : > { %p114_p2 = pnand %p594_p0, %p113_p1 }
   0x5   : > { %s595_s13 = sshll.u32 (!%p114_p2), %s590_s10, 5 }
   0x6   : > { %117 = sbr.rel (%p114_p2) target bundleno = 268 (0x10c), region = 28  ;;  %p136_p3 = scmp.lt.s32.totalorder (!%p114_p2), %s595_s13, 127 }
   0xb   : > { %v721_v0 = vld [vmem:[%s898_s1 + $0x38] sm:$0xff]   ;;  %v722_v1 = vld [vmem:[%s898_s1 + $0x30] sm:$0xff]   ;;  %s901_s13 = smov (!%p136_p3, %s595_s13), 127  ;;  %v723_v2 = vld [vmem:[%s898_s1 + $0x28] sm:$0xff]   ;;  %vm501_vm0 = vcmask 261120  }
   0xc   : > { %649 = vmatprep.subr.bf16.mxu0 %v721_v0  ;;  %697 = vmatprep.subr.bf16.mxu1 %v721_v0  ;;  %s596_s18 = sshll.u32 %s901_s13, 2  ;;  %v724_v3 = vld [vmem:[%s898_s1 + $0x20] sm:$0xff]   ;;  %v725_v6 = vld [vmem:[%s898_s1 + $0x18] sm:$0xff]   ;;  %v726_v7 = vld [vmem:[%s898_s1 + $0x10] sm:$0xff]   ;;  %s598_s4 = sshll.u32 %s901_s13, 3 }
   0xd   : > { %650 = vmatpush3.bf16.msra.mxu0 %v721_v0  ;;  %705 = vmatpush3.bf16.msra.mxu1 %v721_v0  ;;  %s791_s21 = scalar_lea.vmem %s897_s0, %s596_s18  ;;  %v727_v8 = vld [vmem:[%s898_s1 + $0x8] sm:$0xff]   ;;  %v728_v9 = vld [vmem:[%s898_s1] sm:$0xff]   ;;  %s828_s7 = scalar_lea.vmem %s899_s2, %s598_s4 }
   0xe   : > { %651 = vmatprep.subr.bf16.mxu0 %v722_v1  ;;  %698 = vmatprep.subr.bf16.mxu1 %v722_v1  ;;  %v729_v4 = vld [vmem:[%s791_s21] sm:$0xff]   ;;  %v731_v10 = vld [vmem:[%s791_s21 + $0x8] sm:$0xff]   ;;  %v733_v12 = vld [vmem:[%s791_s21 + $0x10] sm:$0xff]  }
   0xf   : > { %v730_v5 = vld [vmem:[%s791_s21 + $0x40] sm:$0xff]   ;;  %665 = vmatprep.mubr.bf16.mxu0 %v729_v4  ;;  %v732_v11 = vld [vmem:[%s791_s21 + $0x48] sm:$0xff]   ;;  %v734_v13 = vld [vmem:[%s791_s21 + $0x50] sm:$0xff]  }
  0x10   : > { %681 = vmatprep.mubr.bf16.mxu1 %v730_v5  ;;  %v735_v14 = vld [vmem:[%s791_s21 + $0x18] sm:$0xff]   ;;  %v737_v16 = vld [vmem:[%s791_s21 + $0x20] sm:$0xff]   ;;  %v739_v18 = vld [vmem:[%s791_s21 + $0x28] sm:$0xff]  }
  0x11   : > { %652 = vmatpush3.bf16.msra.mxu0 %v722_v1  ;;  %706 = vmatpush3.bf16.msra.mxu1 %v722_v1  ;;  %v736_v15 = vld [vmem:[%s791_s21 + $0x58] sm:$0xff]   ;;  %v738_v17 = vld [vmem:[%s791_s21 + $0x60] sm:$0xff]   ;;  %v740_v19 = vld [vmem:[%s791_s21 + $0x68] sm:$0xff]  }
  0x12   : > { %653 = vmatprep.subr.bf16.mxu0 %v723_v2  ;;  %699 = vmatprep.subr.bf16.mxu1 %v723_v2  ;;  %v741_v20 = vld [vmem:[%s791_s21 + $0x30] sm:$0xff]   ;;  %v743_v22 = vld [vmem:[%s791_s21 + $0x38] sm:$0xff]  }
  0x13   : > { %v742_v21 = vld [vmem:[%s791_s21 + $0x70] sm:$0xff]   ;;  %v744_v23 = vld [vmem:[%s791_s21 + $0x78] sm:$0xff]  }
  0x15   : > { %654 = vmatpush3.bf16.msra.mxu0 %v723_v2  ;;  %707 = vmatpush3.bf16.msra.mxu1 %v723_v2 }
  0x16   : > { %655 = vmatprep.subr.bf16.mxu0 %v724_v3  ;;  %700 = vmatprep.subr.bf16.mxu1 %v724_v3 }
  0x19   : > { %656 = vmatpush3.bf16.msra.mxu0 %v724_v3  ;;  %708 = vmatpush3.bf16.msra.mxu1 %v724_v3 }
  0x1a   : > { %657 = vmatprep.subr.bf16.mxu0 %v725_v6  ;;  %701 = vmatprep.subr.bf16.mxu1 %v725_v6 }
  0x1d   : > { %658 = vmatpush3.bf16.msra.mxu0 %v725_v6  ;;  %709 = vmatpush3.bf16.msra.mxu1 %v725_v6 }
  0x1e   : > { %659 = vmatprep.subr.bf16.mxu0 %v726_v7  ;;  %702 = vmatprep.subr.bf16.mxu1 %v726_v7 }
  0x21   : > { %660 = vmatpush3.bf16.msra.mxu0 %v726_v7  ;;  %710 = vmatpush3.bf16.msra.mxu1 %v726_v7 }
  0x22   : > { %661 = vmatprep.subr.bf16.mxu0 %v727_v8  ;;  %703 = vmatprep.subr.bf16.mxu1 %v727_v8 }
  0x25   : > { %662 = vmatpush3.bf16.msra.mxu0 %v727_v8  ;;  %711 = vmatpush3.bf16.msra.mxu1 %v727_v8 }
  0x26   : > { %663 = vmatprep.subr.bf16.mxu0 %v728_v9  ;;  %704 = vmatprep.subr.bf16.mxu1 %v728_v9 }
  0x29   : > { %664 = vmatpush3.bf16.msra.mxu0 %v728_v9  ;;  %712 = vmatpush3.bf16.msra.mxu1 %v728_v9 }
  0x2c   : > { %666 = vmatmul.mubr.bf16.vlgmr.msra.gmra.mxu0 %v731_v10  ;;  %682 = vmatmul.mubr.bf16.vlgmr.msra.gmra.mxu1 %v732_v11 }
  0x2d   : > { %669 = vmatprep.mubr.bf16.mxu0 %v733_v12  ;;  %685 = vmatprep.mubr.bf16.mxu1 %v734_v13 }
  0x34   : > { %670 = vmatmul.mubr.bf16.gmra.mxu0 %v735_v14  ;;  %686 = vmatmul.mubr.bf16.gmra.mxu1 %v736_v15 }
  0x35   : > { %673 = vmatprep.mubr.bf16.mxu0 %v737_v16  ;;  %689 = vmatprep.mubr.bf16.mxu1 %v738_v17 }
  0x3c   : > { %674 = vmatmul.mubr.bf16.gmra.mxu0 %v739_v18  ;;  %690 = vmatmul.mubr.bf16.gmra.mxu1 %v740_v19 }
  0x3d   : > { %677 = vmatprep.mubr.bf16.mxu0 %v741_v20  ;;  %693 = vmatprep.mubr.bf16.mxu1 %v742_v21 }
  0x44   : > { %678 = vmatmul.mubr.bf16.gmra.mxu0 %v743_v22  ;;  %694 = vmatmul.mubr.bf16.gmra.mxu1 %v744_v23 }
  0xec   : > { %v667_v24 = vpop.f32.mrf.mxu0  ;;  %v683_v25 = vpop.f32.mrf.mxu1 }
  0xed   : > { %504 = vst.msk [vmem:[%s828_s7 + $0x10] sm:$0xff] %vm501_vm0, %v667_v24  ;;  %520 = vst.msk [vmem:[%s828_s7 + $0x90] sm:$0xff] %vm501_vm0, %v683_v25 }
  0xee   : > { %v374_v26 = vpop.f32.mrf.mxu0  ;;  %v438_v27 = vpop.f32.mrf.mxu1 }
  0xef   : > { %502 = vst.msk [vmem:[%s828_s7] sm:$0xff] %vm501_vm0, %v374_v26  ;;  %518 = vst.msk [vmem:[%s828_s7 + $0x80] sm:$0xff] %vm501_vm0, %v438_v27 }
  0xf0   : > { %v668_v28 = vpop.f32.mrf.mxu0  ;;  %v684_v29 = vpop.f32.mrf.mxu1 }
  0xf1   : > { %505 = vst.msk [vmem:[%s828_s7 + $0x18] sm:$0xff] %vm501_vm0, %v668_v28  ;;  %521 = vst.msk [vmem:[%s828_s7 + $0x98] sm:$0xff] %vm501_vm0, %v684_v29 }
  0xf2   : > { %v377_v30 = vpop.f32.mrf.mxu0  ;;  %v441_v31 = vpop.f32.mrf.mxu1 }
  0xf3   : > { %503 = vst.msk [vmem:[%s828_s7 + $0x8] sm:$0xff] %vm501_vm0, %v377_v30  ;;  %519 = vst.msk [vmem:[%s828_s7 + $0x88] sm:$0xff] %vm501_vm0, %v441_v31 }
  0xf4   : > { %v671_v32 = vpop.f32.mrf.mxu0  ;;  %v687_v33 = vpop.f32.mrf.mxu1 }
  0xf5   : > { %508 = vst.msk [vmem:[%s828_s7 + $0x30] sm:$0xff] %vm501_vm0, %v671_v32  ;;  %524 = vst.msk [vmem:[%s828_s7 + $0xb0] sm:$0xff] %vm501_vm0, %v687_v33 }
  0xf6   : > { %v390_v34 = vpop.f32.mrf.mxu0  ;;  %v454_v35 = vpop.f32.mrf.mxu1 }
  0xf7   : > { %506 = vst.msk [vmem:[%s828_s7 + $0x20] sm:$0xff] %vm501_vm0, %v390_v34  ;;  %522 = vst.msk [vmem:[%s828_s7 + $0xa0] sm:$0xff] %vm501_vm0, %v454_v35 }
  0xf8   : > { %v672_v36 = vpop.f32.mrf.mxu0  ;;  %v688_v37 = vpop.f32.mrf.mxu1 }
  0xf9   : > { %509 = vst.msk [vmem:[%s828_s7 + $0x38] sm:$0xff] %vm501_vm0, %v672_v36  ;;  %525 = vst.msk [vmem:[%s828_s7 + $0xb8] sm:$0xff] %vm501_vm0, %v688_v37 }
  0xfa   : > { %v393_v38 = vpop.f32.mrf.mxu0  ;;  %v457_v39 = vpop.f32.mrf.mxu1 }
  0xfb   : > { %507 = vst.msk [vmem:[%s828_s7 + $0x28] sm:$0xff] %vm501_vm0, %v393_v38  ;;  %523 = vst.msk [vmem:[%s828_s7 + $0xa8] sm:$0xff] %vm501_vm0, %v457_v39 }
  0xfc   : > { %v675_v40 = vpop.f32.mrf.mxu0  ;;  %v691_v41 = vpop.f32.mrf.mxu1 }
  0xfd   : > { %512 = vst.msk [vmem:[%s828_s7 + $0x50] sm:$0xff] %vm501_vm0, %v675_v40  ;;  %528 = vst.msk [vmem:[%s828_s7 + $0xd0] sm:$0xff] %vm501_vm0, %v691_v41 }
  0xfe   : > { %v406_v42 = vpop.f32.mrf.mxu0  ;;  %v470_v43 = vpop.f32.mrf.mxu1 }
  0xff   : > { %510 = vst.msk [vmem:[%s828_s7 + $0x40] sm:$0xff] %vm501_vm0, %v406_v42  ;;  %526 = vst.msk [vmem:[%s828_s7 + $0xc0] sm:$0xff] %vm501_vm0, %v470_v43 }
 0x100   : > { %v676_v44 = vpop.f32.mrf.mxu0  ;;  %v692_v45 = vpop.f32.mrf.mxu1 }
 0x101   : > { %513 = vst.msk [vmem:[%s828_s7 + $0x58] sm:$0xff] %vm501_vm0, %v676_v44  ;;  %529 = vst.msk [vmem:[%s828_s7 + $0xd8] sm:$0xff] %vm501_vm0, %v692_v45 }
 0x102   : > { %v409_v46 = vpop.f32.mrf.mxu0  ;;  %v473_v47 = vpop.f32.mrf.mxu1 }
 0x103   : > { %511 = vst.msk [vmem:[%s828_s7 + $0x48] sm:$0xff] %vm501_vm0, %v409_v46  ;;  %527 = vst.msk [vmem:[%s828_s7 + $0xc8] sm:$0xff] %vm501_vm0, %v473_v47 }
 0x104   : > { %v679_v48 = vpop.f32.mrf.mxu0  ;;  %v695_v49 = vpop.f32.mrf.mxu1 }
 0x105   : > { %516 = vst.msk [vmem:[%s828_s7 + $0x70] sm:$0xff] %vm501_vm0, %v679_v48  ;;  %532 = vst.msk [vmem:[%s828_s7 + $0xf0] sm:$0xff] %vm501_vm0, %v695_v49 }
 0x106   : > { %v422_v50 = vpop.f32.mrf.mxu0  ;;  %v486_v51 = vpop.f32.mrf.mxu1 }
 0x107   : > { %514 = vst.msk [vmem:[%s828_s7 + $0x60] sm:$0xff] %vm501_vm0, %v422_v50  ;;  %530 = vst.msk [vmem:[%s828_s7 + $0xe0] sm:$0xff] %vm501_vm0, %v486_v51 }
 0x108   : > { %v680_v52 = vpop.f32.mrf.mxu0  ;;  %v696_v53 = vpop.f32.mrf.mxu1 }
 0x109   : > { %517 = vst.msk [vmem:[%s828_s7 + $0x78] sm:$0xff] %vm501_vm0, %v680_v52  ;;  %533 = vst.msk [vmem:[%s828_s7 + $0xf8] sm:$0xff] %vm501_vm0, %v696_v53 }
 0x10a   : > { %v425_v54 = vpop.f32.mrf.mxu0  ;;  %v489_v55 = vpop.f32.mrf.mxu1 }
 0x10b   : > { %515 = vst.msk [vmem:[%s828_s7 + $0x68] sm:$0xff] %vm501_vm0, %v425_v54  ;;  %531 = vst.msk [vmem:[%s828_s7 + $0xe8] sm:$0xff] %vm501_vm0, %v489_v55 }
 0x10c PF: > { %s12_s9 = sadd.s32 1, %s751_s9  }
 0x10d   : > { %p9_p4 = scmp.ge.s32.totalorder %s12_s9, 6  }
 0x10f   :  { %11 = sbr.rel (!%p9_p4) target bundleno = 1 (0x1), region = 58 }

// kernel: semantic_attention.2
= control target key start
LH: loop header
LB: loop body
LE: loop exit
PB: predicated region body
PF: predicated region fallthrough
CT: control target
= control target key end

     0   :  { %s1799_s12 = smov 0   ;;  %s1801_s13 = smov 0   ;;  %s2461_s0 = inlined_call_operand.vmem [shape: bf16[1024,128], index: 0, kind: input, shape index: {}]   ;;  %s2462_s1 = inlined_call_operand.vmem [shape: bf16[128,512], index: 1, kind: input, shape index: {}]   ;;  %s2463_s2 = inlined_call_operand.vmem [shape: f32[1,512], index: 2, kind: input, shape index: {}]   ;;  %s2464_s3 = inlined_call_operand.vmem [shape: f32[2,1,512], index: 3, kind: output, shape index: {}]  }
   0x1   :  { %s1803_s14 = smov 0   ;;  %s1805_s15 = smov 0  }
   0x2   :  { %s1807_s16 = smov 0  }
   0x3 LB: > { %s22_s17 = sadd.s32 1, %s1766_s14  ;;  %s25_s18 = sadd.s32 1, %s1770_s15  ;;  %s1774_s16 = sphi %s1807_s16, %s13_s16   ;;  %s1770_s15 = sphi %s1805_s15, %s2511_s15   ;;  %s1766_s14 = sphi %s1803_s14, %s2510_s14   ;;  %s1762_s13 = sphi %s1801_s13, %s2509_s13   ;;  %s1758_s12 = sphi %s1799_s12, %s2508_s12  }
   0x4   : > { %p23_p0 = scmp.ge.s32.totalorder %s22_s17, 2  ;;  %p1317_p1 = scmp.ge.s32.totalorder %s1774_s16, 1 }
   0x5   : > { %p158_p2 = scmp.lt.s32.totalorder %s1774_s16, 5 }
   0x6   : > { %s2513_s17 = smov (%p23_p0, %s22_s17), 0  ;;  %s2515_s18 = smov (!%p23_p0, %s25_s18), %s1770_s15 }
   0x7   : > { %p159_p3 = pnand %p1317_p1, %p158_p2  ;;  %p27_p4 = scmp.ge.s32.totalorder %s2515_s18, 2 }
   0x9   : > { %s2517_s18 = smov (%p27_p4, %s2515_s18), 0  ;;  %162 = sbr.rel (%p159_p3) target bundleno = 422 (0x1a6), region = 32 }
   0xe   : > { %s1318_s19 = sshll.u32 %s1762_s13, 1  ;;  %p193_p5 = scmp.lt.s32.totalorder %s1762_s13, 1 }
   0xf   : > { %s184_s20 = sadd.s32 %s1758_s12, %s1318_s19  ;;  %p1322_p7 = scmp.ne.s32.totalorder %s1758_s12, 0 }
  0x10   : > { %s1319_s21 = sshll.u32 %s184_s20, 5  ;;  %s2519_s13 = smov (!%p193_p5, %s1762_s13), 1 }
  0x11   : > { %p186_p6 = scmp.lt.s32.totalorder %s1319_s21, 127  ;;  %s1321_s22 = sshll.u32 %s2519_s13, 2 }
  0x12   : > { %s1832_s26 = scalar_lea.vmem %s2464_s3, %s1321_s22  ;;  %201 = sbr.rel (%p1322_p7) target bundleno = 27 (0x1b), region = 36 }
  0x13   : > { %s2521_s21 = smov (!%p186_p6, %s1319_s21), 127 }
  0x14   : > { %s1320_s23 = sshll.u32 %s2521_s21, 2 }
  0x15   : > { %s1837_s29 = scalar_lea.vmem %s2461_s0, %s1320_s23 }
  0x17   : > { %v202_v0 = vlaneseq  ;;  %v1776_v1 = vmov 0.0  }
  0x19   : > { %vm204_vm0 = vcmp.lt.s32.totalorder %v202_v0, 512 }
  0x1a   : > { %206 = vst.msk [vmem:[%s1832_s26] sm:$0xf] %vm204_vm0, %v1776_v1 }
  0x1b PF: > { %v1416_v2 = vld [vmem:[%s2462_s1 + $0xe4] ss:$16 sps:$4 sm:$0xff]   ;;  %v1418_v3 = vld [vmem:[%s2462_s1 + $0xec] ss:$16 sps:$4 sm:$0xff]   ;;  %v1777_v4 = vmov 0   ;;  %v2465_v51 = vlaneseq }
  0x1c   : > { %581 = vmatprep.mubr.bf16.mxu0 %v1777_v4  ;;  %774 = vmatprep.mubr.bf16.mxu1 %v1777_v4  ;;  %v1420_v5 = vld [vmem:[%s2462_s1 + $0xe0] ss:$16 sps:$4 sm:$0xff]   ;;  %v1421_v6 = vld [vmem:[%s2462_s1 + $0xe8] ss:$16 sps:$4 sm:$0xff]   ;;  %v1422_v7 = vld [vmem:[%s2462_s1 + $0xc4] ss:$16 sps:$4 sm:$0xff]  }
  0x1d   : > { %549 = vmatprep.subr.bf16.mxu0 %v1416_v2  ;;  %742 = vmatprep.subr.bf16.mxu1 %v1418_v3  ;;  %v1424_v8 = vld [vmem:[%s2462_s1 + $0xcc] ss:$16 sps:$4 sm:$0xff]   ;;  %v1426_v9 = vld [vmem:[%s2462_s1 + $0xc0] ss:$16 sps:$4 sm:$0xff]   ;;  %v1427_v10 = vld [vmem:[%s2462_s1 + $0xc8] ss:$16 sps:$4 sm:$0xff]  }
  0x1e   : > { %550 = vmatpush1.bf16.msra.mxu0 %v1420_v5  ;;  %743 = vmatpush1.bf16.msra.mxu1 %v1421_v6  ;;  %v1428_v11 = vld [vmem:[%s2462_s1 + $0xa4] ss:$16 sps:$4 sm:$0xff]   ;;  %v1430_v12 = vld [vmem:[%s2462_s1 + $0xac] ss:$16 sps:$4 sm:$0xff]   ;;  %v1432_v13 = vld [vmem:[%s2462_s1 + $0xa0] ss:$16 sps:$4 sm:$0xff]  }
  0x1f   : > { %551 = vmatprep.subr.bf16.mxu0 %v1422_v7  ;;  %744 = vmatprep.subr.bf16.mxu1 %v1424_v8  ;;  %v1433_v14 = vld [vmem:[%s2462_s1 + $0xa8] ss:$16 sps:$4 sm:$0xff]   ;;  %v1434_v15 = vld [vmem:[%s2462_s1 + $0x84] ss:$16 sps:$4 sm:$0xff]   ;;  %v1436_v16 = vld [vmem:[%s2462_s1 + $0x8c] ss:$16 sps:$4 sm:$0xff]  }
  0x20   : > { %v1438_v17 = vld [vmem:[%s2462_s1 + $0x80] ss:$16 sps:$4 sm:$0xff]   ;;  %v1439_v18 = vld [vmem:[%s2462_s1 + $0x88] ss:$16 sps:$4 sm:$0xff]   ;;  %v1440_v19 = vld [vmem:[%s2462_s1 + $0x64] ss:$16 sps:$4 sm:$0xff]  }
  0x21   : > { %v1442_v20 = vld [vmem:[%s2462_s1 + $0x6c] ss:$16 sps:$4 sm:$0xff]   ;;  %v1444_v21 = vld [vmem:[%s2462_s1 + $0x60] ss:$16 sps:$4 sm:$0xff]   ;;  %v1445_v22 = vld [vmem:[%s2462_s1 + $0x68] ss:$16 sps:$4 sm:$0xff]  }
  0x22   : > { %552 = vmatpush1.bf16.msra.mxu0 %v1426_v9  ;;  %745 = vmatpush1.bf16.msra.mxu1 %v1427_v10  ;;  %v1446_v23 = vld [vmem:[%s2462_s1 + $0x44] ss:$16 sps:$4 sm:$0xff]   ;;  %v1448_v24 = vld [vmem:[%s2462_s1 + $0x4c] ss:$16 sps:$4 sm:$0xff]   ;;  %v1450_v25 = vld [vmem:[%s2462_s1 + $0x40] ss:$16 sps:$4 sm:$0xff]  }
  0x23   : > { %553 = vmatprep.subr.bf16.mxu0 %v1428_v11  ;;  %746 = vmatprep.subr.bf16.mxu1 %v1430_v12  ;;  %v1451_v26 = vld [vmem:[%s2462_s1 + $0x48] ss:$16 sps:$4 sm:$0xff]   ;;  %v1452_v27 = vld [vmem:[%s2462_s1 + $0x24] ss:$16 sps:$4 sm:$0xff]   ;;  %v1454_v28 = vld [vmem:[%s2462_s1 + $0x2c] ss:$16 sps:$4 sm:$0xff]  }
  0x24   : > { %v1456_v29 = vld [vmem:[%s2462_s1 + $0x20] ss:$16 sps:$4 sm:$0xff]   ;;  %v1457_v30 = vld [vmem:[%s2462_s1 + $0x28] ss:$16 sps:$4 sm:$0xff]   ;;  %v1458_v31 = vld [vmem:[%s2462_s1 + $0x4] ss:$16 sps:$4 sm:$0xff]  }
  0x25   : > { %v1460_v32 = vld [vmem:[%s2462_s1 + $0xc] ss:$16 sps:$4 sm:$0xff]   ;;  %v1462_v33 = vld [vmem:[%s2462_s1] ss:$16 sps:$4 sm:$0xff]   ;;  %v1463_v34 = vld [vmem:[%s2462_s1 + $0x8] ss:$16 sps:$4 sm:$0xff]  }
  0x26   : > { %554 = vmatpush1.bf16.msra.mxu0 %v1432_v13  ;;  %747 = vmatpush1.bf16.msra.mxu1 %v1433_v14  ;;  %v1464_v35 = vld [vmem:[%s1837_s29] sm:$0xff]   ;;  %v1465_v36 = vld [vmem:[%s1837_s29 + $0x8] sm:$0xff]   ;;  %v1466_v37 = vld [vmem:[%s1837_s29 + $0x10] sm:$0xff]   ;;  %v1985_v52 = vshrl.u32 %v2465_v51, 7 }
  0x27   : > { %555 = vmatprep.subr.bf16.mxu0 %v1434_v15  ;;  %748 = vmatprep.subr.bf16.mxu1 %v1436_v16  ;;  %v1467_v38 = vld [vmem:[%s1837_s29 + $0x18] sm:$0xff]   ;;  %v1468_v39 = vld [vmem:[%s1837_s29 + $0x20] sm:$0xff]   ;;  %v1469_v40 = vld [vmem:[%s1837_s29 + $0x28] sm:$0xff]  }
  0x28   : > { %v1470_v41 = vld [vmem:[%s1837_s29 + $0x30] sm:$0xff]   ;;  %v1471_v42 = vld [vmem:[%s1837_s29 + $0x38] sm:$0xff]   ;;  %v1472_v43 = vld [vmem:[%s1837_s29 + $0x40] sm:$0xff]   ;;  %2467 = vst [vmem:[#allocation2_spill] sm:$0xff] %v1985_v52  ;;  %v275_v53 = vsub.s32 0, %v1985_v52  ;;  %v283_v54 = vsub.s32 2, %v1985_v52 }
  0x29   : > { %v1473_v44 = vld [vmem:[%s1837_s29 + $0x48] sm:$0xff]   ;;  %v1474_v45 = vld [vmem:[%s1837_s29 + $0x50] sm:$0xff]   ;;  %v1475_v46 = vld [vmem:[%s1837_s29 + $0x58] sm:$0xff]   ;;  %v279_v56 = vsub.s32 1, %v1985_v52  ;;  %v287_v57 = vsub.s32 3, %v1985_v52 }
  0x2a   : > { %556 = vmatpush1.bf16.msra.mxu0 %v1438_v17  ;;  %749 = vmatpush1.bf16.msra.mxu1 %v1439_v18  ;;  %v1476_v47 = vld [vmem:[%s1837_s29 + $0x60] sm:$0xff]   ;;  %v1477_v48 = vld [vmem:[%s1837_s29 + $0x68] sm:$0xff]   ;;  %v1478_v49 = vld [vmem:[%s1837_s29 + $0x70] sm:$0xff]  }
  0x2b   : > { %557 = vmatprep.subr.bf16.mxu0 %v1440_v19  ;;  %750 = vmatprep.subr.bf16.mxu1 %v1442_v20  ;;  %v1479_v50 = vld [vmem:[%s1837_s29 + $0x78] sm:$0xff]   ;;  %v271_v55 = vld [vmem:[%s2463_s2] sm:$0xf] }
  0x2c   : > { %v1994_v58 = vrot.slane %v271_v55, %v275_v53  ;;  %v1996_v59 = vrot.slane %v271_v55, %v283_v54  ;;  %v1998_v60 = vrot.slane %v271_v55, %v279_v56  ;;  %v2000_v61 = vrot.slane %v271_v55, %v287_v57 }
  0x2e   : > { %558 = vmatpush1.bf16.msra.mxu0 %v1444_v21  ;;  %751 = vmatpush1.bf16.msra.mxu1 %v1445_v22 }
  0x2f   : > { %559 = vmatprep.subr.bf16.mxu0 %v1446_v23  ;;  %752 = vmatprep.subr.bf16.mxu1 %v1448_v24 }
  0x32   : > { %560 = vmatpush1.bf16.msra.mxu0 %v1450_v25  ;;  %753 = vmatpush1.bf16.msra.mxu1 %v1451_v26 }
  0x33   : > { %561 = vmatprep.subr.bf16.mxu0 %v1452_v27  ;;  %754 = vmatprep.subr.bf16.mxu1 %v1454_v28 }
  0x36   : > { %562 = vmatpush1.bf16.msra.mxu0 %v1456_v29  ;;  %755 = vmatpush1.bf16.msra.mxu1 %v1457_v30 }
  0x37   : > { %563 = vmatprep.subr.bf16.mxu0 %v1458_v31  ;;  %756 = vmatprep.subr.bf16.mxu1 %v1460_v32 }
  0x3a   : > { %564 = vmatpush1.bf16.msra.mxu0 %v1462_v33  ;;  %757 = vmatpush1.bf16.msra.mxu1 %v1463_v34 }
  0x3d   : > { %582 = vmatmul.mubr.bf16.vlgmr.msra.gmra.mxu0 %v1464_v35  ;;  %775 = vmatmul.mubr.bf16.vlgmr.msra.gmra.mxu1 %v1464_v35 }
  0x3e   : > { %591 = vmatprep.mubr.bf16.mxu0 %v1777_v4  ;;  %784 = vmatprep.mubr.bf16.mxu1 %v1777_v4 }
  0x45   : > { %592 = vmatmul.mubr.bf16.gmra.mxu0 %v1465_v36  ;;  %785 = vmatmul.mubr.bf16.gmra.mxu1 %v1465_v36 }
  0x46   : > { %601 = vmatprep.mubr.bf16.mxu0 %v1777_v4  ;;  %794 = vmatprep.mubr.bf16.mxu1 %v1777_v4 }
  0x4d   : > { %602 = vmatmul.mubr.bf16.gmra.mxu0 %v1466_v37  ;;  %795 = vmatmul.mubr.bf16.gmra.mxu1 %v1466_v37 }
  0x4e   : > { %611 = vmatprep.mubr.bf16.mxu0 %v1777_v4  ;;  %804 = vmatprep.mubr.bf16.mxu1 %v1777_v4 }
  0x55   : > { %612 = vmatmul.mubr.bf16.gmra.mxu0 %v1467_v38  ;;  %805 = vmatmul.mubr.bf16.gmra.mxu1 %v1467_v38 }
  0x56   : > { %621 = vmatprep.mubr.bf16.mxu0 %v1777_v4  ;;  %814 = vmatprep.mubr.bf16.mxu1 %v1777_v4 }
  0x5d   : > { %622 = vmatmul.mubr.bf16.gmra.mxu0 %v1468_v39  ;;  %815 = vmatmul.mubr.bf16.gmra.mxu1 %v1468_v39 }
  0x5e   : > { %631 = vmatprep.mubr.bf16.mxu0 %v1777_v4  ;;  %824 = vmatprep.mubr.bf16.mxu1 %v1777_v4 }
  0x65   : > { %632 = vmatmul.mubr.bf16.gmra.mxu0 %v1469_v40  ;;  %825 = vmatmul.mubr.bf16.gmra.mxu1 %v1469_v40 }
  0x66   : > { %641 = vmatprep.mubr.bf16.mxu0 %v1777_v4  ;;  %834 = vmatprep.mubr.bf16.mxu1 %v1777_v4 }
  0x6d   : > { %642 = vmatmul.mubr.bf16.gmra.mxu0 %v1470_v41  ;;  %835 = vmatmul.mubr.bf16.gmra.mxu1 %v1470_v41 }
  0x6e   : > { %651 = vmatprep.mubr.bf16.mxu0 %v1777_v4  ;;  %844 = vmatprep.mubr.bf16.mxu1 %v1777_v4 }
  0x75   : > { %652 = vmatmul.mubr.bf16.gmra.mxu0 %v1471_v42  ;;  %845 = vmatmul.mubr.bf16.gmra.mxu1 %v1471_v42 }
  0x76   : > { %661 = vmatprep.mubr.bf16.mxu0 %v1777_v4  ;;  %854 = vmatprep.mubr.bf16.mxu1 %v1777_v4 }
  0x7d   : > { %662 = vmatmul.mubr.bf16.gmra.mxu0 %v1472_v43  ;;  %855 = vmatmul.mubr.bf16.gmra.mxu1 %v1472_v43 }
  0x7e   : > { %671 = vmatprep.mubr.bf16.mxu0 %v1777_v4  ;;  %864 = vmatprep.mubr.bf16.mxu1 %v1777_v4 }
  0x85   : > { %672 = vmatmul.mubr.bf16.gmra.mxu0 %v1473_v44  ;;  %865 = vmatmul.mubr.bf16.gmra.mxu1 %v1473_v44 }
  0x86   : > { %681 = vmatprep.mubr.bf16.mxu0 %v1777_v4  ;;  %874 = vmatprep.mubr.bf16.mxu1 %v1777_v4 }
  0x8d   : > { %682 = vmatmul.mubr.bf16.gmra.mxu0 %v1474_v45  ;;  %875 = vmatmul.mubr.bf16.gmra.mxu1 %v1474_v45 }
  0x8e   : > { %691 = vmatprep.mubr.bf16.mxu0 %v1777_v4  ;;  %884 = vmatprep.mubr.bf16.mxu1 %v1777_v4 }
  0x95   : > { %692 = vmatmul.mubr.bf16.gmra.mxu0 %v1475_v46  ;;  %885 = vmatmul.mubr.bf16.gmra.mxu1 %v1475_v46 }
  0x96   : > { %701 = vmatprep.mubr.bf16.mxu0 %v1777_v4  ;;  %894 = vmatprep.mubr.bf16.mxu1 %v1777_v4 }
  0x9d   : > { %702 = vmatmul.mubr.bf16.gmra.mxu0 %v1476_v47  ;;  %895 = vmatmul.mubr.bf16.gmra.mxu1 %v1476_v47 }
  0x9e   : > { %711 = vmatprep.mubr.bf16.mxu0 %v1777_v4  ;;  %904 = vmatprep.mubr.bf16.mxu1 %v1777_v4 }
  0xa5   : > { %712 = vmatmul.mubr.bf16.gmra.mxu0 %v1477_v48  ;;  %905 = vmatmul.mubr.bf16.gmra.mxu1 %v1477_v48 }
  0xa6   : > { %721 = vmatprep.mubr.bf16.mxu0 %v1777_v4  ;;  %914 = vmatprep.mubr.bf16.mxu1 %v1777_v4 }
  0xad   : > { %722 = vmatmul.mubr.bf16.gmra.mxu0 %v1478_v49  ;;  %915 = vmatmul.mubr.bf16.gmra.mxu1 %v1478_v49 }
  0xae   : > { %731 = vmatprep.mubr.bf16.mxu0 %v1777_v4  ;;  %924 = vmatprep.mubr.bf16.mxu1 %v1777_v4 }
  0xb5   : > { %732 = vmatmul.mubr.bf16.gmra.mxu0 %v1479_v50  ;;  %925 = vmatmul.mubr.bf16.gmra.mxu1 %v1479_v50 }
  0xfd   : > { %v583_v62 = vpop.f32.mrf.mxu0  ;;  %v776_v63 = vpop.f32.mrf.mxu1 }
  0xfe   : > { %v584_v0 = vadd.f32 %v583_v62, %v1994_v58  ;;  %v777_v1 = vadd.f32 %v776_v63, %v1996_v59 }
  0xff   : > { %v585_v2 = vpop.f32.mrf.mxu0  ;;  %v778_v3 = vpop.f32.mrf.mxu1 }
 0x100   : > { %1480 = vtanh.f32 %v584_v0  ;;  %v586_v4 = vadd.f32 %v585_v2, %v1998_v60  ;;  %v779_v5 = vadd.f32 %v778_v3, %v2000_v61 }
 0x101   : > { %1482 = vtanh.f32 %v777_v1  ;;  %v587_v6 = vpop.f32.mrf.mxu0  ;;  %v780_v7 = vpop.f32.mrf.mxu1 }
 0x102   : > { %1484 = vtanh.f32 %v586_v4  ;;  %v588_v8 = vadd.f32 %v587_v6, %v1994_v58  ;;  %v781_v9 = vadd.f32 %v780_v7, %v1996_v59 }
 0x103   : > { %1486 = vtanh.f32 %v779_v5  ;;  %v589_v10 = vpop.f32.mrf.mxu0  ;;  %v782_v11 = vpop.f32.mrf.mxu1 }
 0x104   : > { %1488 = vtanh.f32 %v588_v8  ;;  %v590_v12 = vadd.f32 %v589_v10, %v1998_v60  ;;  %v783_v13 = vadd.f32 %v782_v11, %v2000_v61 }
 0x105   : > { %1490 = vtanh.f32 %v781_v9  ;;  %v593_v14 = vpop.f32.mrf.mxu0  ;;  %v786_v15 = vpop.f32.mrf.mxu1 }
 0x106   : > { %1492 = vtanh.f32 %v590_v12  ;;  %v594_v16 = vadd.f32 %v593_v14, %v1994_v58  ;;  %v787_v17 = vadd.f32 %v786_v15, %v1996_v59 }
 0x107   : > { %1494 = vtanh.f32 %v783_v13  ;;  %v595_v18 = vpop.f32.mrf.mxu0  ;;  %v788_v19 = vpop.f32.mrf.mxu1 }
 0x108   : > { %1496 = vtanh.f32 %v594_v16  ;;  %v596_v20 = vadd.f32 %v595_v18, %v1998_v60  ;;  %v789_v21 = vadd.f32 %v788_v19, %v2000_v61 }
 0x109   : > { %1498 = vtanh.f32 %v787_v17  ;;  %v597_v22 = vpop.f32.mrf.mxu0  ;;  %v790_v23 = vpop.f32.mrf.mxu1 }
 0x10a   : > { %1500 = vtanh.f32 %v596_v20  ;;  %v598_v24 = vadd.f32 %v597_v22, %v1994_v58  ;;  %v791_v25 = vadd.f32 %v790_v23, %v1996_v59 }
 0x10b   : > { %1502 = vtanh.f32 %v789_v21  ;;  %v599_v26 = vpop.f32.mrf.mxu0  ;;  %v792_v27 = vpop.f32.mrf.mxu1 }
 0x10c   : > { %1504 = vtanh.f32 %v598_v24  ;;  %v600_v28 = vadd.f32 %v599_v26, %v1998_v60  ;;  %v793_v29 = vadd.f32 %v792_v27, %v2000_v61 }
 0x10d   : > { %v2018_v30 = vpop.eup %1480  ;;  %1506 = vtanh.f32 %v791_v25  ;;  %v603_v31 = vpop.f32.mrf.mxu0 }
 0x10e   : > { %v796_v32 = vpop.f32.mrf.mxu1  ;;  %v2020_v33 = vpop.eup %1482  ;;  %1508 = vtanh.f32 %v600_v28  ;;  %v604_v34 = vadd.f32 %v603_v31, %v1994_v58 }
 0x10f   : > { %v797_v35 = vadd.f32 %v796_v32, %v1996_v59  ;;  %v2024_v36 = vpop.eup %1484  ;;  %1510 = vtanh.f32 %v793_v29  ;;  %v605_v37 = vpop.f32.mrf.mxu0 }
 0x110   : > { %v798_v38 = vpop.f32.mrf.mxu1  ;;  %v2026_v39 = vpop.eup %1486  ;;  %1512 = vtanh.f32 %v604_v34  ;;  %v606_v40 = vadd.f32 %v605_v37, %v1998_v60 }
 0x111   : > { %v799_v41 = vadd.f32 %v798_v38, %v2000_v61  ;;  %v2030_v42 = vpop.eup %1488  ;;  %1514 = vtanh.f32 %v797_v35  ;;  %v607_v43 = vpop.f32.mrf.mxu0 }
 0x112   : > { %v800_v44 = vpop.f32.mrf.mxu1  ;;  %v2032_v45 = vpop.eup %1490  ;;  %1516 = vtanh.f32 %v606_v40  ;;  %v608_v46 = vadd.f32 %v607_v43, %v1994_v58 }
 0x113   : > { %v801_v47 = vadd.f32 %v800_v44, %v1996_v59  ;;  %v2036_v48 = vpop.eup %1492  ;;  %1518 = vtanh.f32 %v799_v41  ;;  %v609_v49 = vpop.f32.mrf.mxu0 }
 0x114   : > { %v802_v50 = vpop.f32.mrf.mxu1  ;;  %v2038_v53 = vpop.eup %1494  ;;  %1520 = vtanh.f32 %v608_v46  ;;  %v610_v54 = vadd.f32 %v609_v49, %v1998_v60 }
 0x115   : > { %v803_v55 = vadd.f32 %v802_v50, %v2000_v61  ;;  %v2042_v56 = vpop.eup %1496  ;;  %1522 = vtanh.f32 %v801_v47  ;;  %v613_v57 = vpop.f32.mrf.mxu0 }
 0x116   : > { %v806_v62 = vpop.f32.mrf.mxu1  ;;  %v2044_v63 = vpop.eup %1498  ;;  %1524 = vtanh.f32 %v610_v54  ;;  %v614_v0 = vadd.f32 %v613_v57, %v1994_v58 }
 0x117   : > { %v807_v1 = vadd.f32 %v806_v62, %v1996_v59  ;;  %v2048_v2 = vpop.eup %1500  ;;  %1526 = vtanh.f32 %v803_v55  ;;  %v615_v3 = vpop.f32.mrf.mxu0 }
 0x118   : > { %v808_v4 = vpop.f32.mrf.mxu1  ;;  %v2050_v5 = vpop.eup %1502  ;;  %1528 = vtanh.f32 %v614_v0  ;;  %v616_v6 = vadd.f32 %v615_v3, %v1998_v60 }
 0x119   : > { %v809_v7 = vadd.f32 %v808_v4, %v2000_v61  ;;  %v2054_v8 = vpop.eup %1504  ;;  %1530 = vtanh.f32 %v807_v1  ;;  %v617_v9 = vpop.f32.mrf.mxu0 }
 0x11a   : > { %v810_v10 = vpop.f32.mrf.mxu1  ;;  %v2056_v11 = vpop.eup %1506  ;;  %1532 = vtanh.f32 %v616_v6  ;;  %v618_v12 = vadd.f32 %v617_v9, %v1994_v58 }
 0x11b   : > { %v811_v13 = vadd.f32 %v810_v10, %v1996_v59  ;;  %v2060_v14 = vpop.eup %1508  ;;  %1534 = vtanh.f32 %v809_v7  ;;  %v619_v15 = vpop.f32.mrf.mxu0 }
 0x11c   : > { %v812_v16 = vpop.f32.mrf.mxu1  ;;  %v2062_v17 = vpop.eup %1510  ;;  %1536 = vtanh.f32 %v618_v12  ;;  %v620_v18 = vadd.f32 %v619_v15, %v1998_v60 }
 0x11d   : > { %v813_v19 = vadd.f32 %v812_v16, %v2000_v61  ;;  %v2066_v20 = vpop.eup %1512  ;;  %1538 = vtanh.f32 %v811_v13  ;;  %v623_v21 = vpop.f32.mrf.mxu0 }
 0x11e   : > { %v816_v22 = vpop.f32.mrf.mxu1  ;;  %v2068_v23 = vpop.eup %1514  ;;  %1540 = vtanh.f32 %v620_v18  ;;  %v624_v24 = vadd.f32 %v623_v21, %v1994_v58 }
 0x11f   : > { %v817_v25 = vadd.f32 %v816_v22, %v1996_v59  ;;  %v2072_v26 = vpop.eup %1516  ;;  %1542 = vtanh.f32 %v813_v19  ;;  %v625_v27 = vpop.f32.mrf.mxu0 }
 0x120   : > { %v818_v28 = vpop.f32.mrf.mxu1  ;;  %v2074_v29 = vpop.eup %1518  ;;  %1544 = vtanh.f32 %v624_v24  ;;  %v626_v31 = vadd.f32 %v625_v27, %v1998_v60 }
 0x121   : > { %v819_v32 = vadd.f32 %v818_v28, %v2000_v61  ;;  %v2078_v34 = vpop.eup %1520  ;;  %1546 = vtanh.f32 %v817_v25  ;;  %v627_v35 = vpop.f32.mrf.mxu0 }
 0x122   : > { %v820_v37 = vpop.f32.mrf.mxu1  ;;  %v2080_v38 = vpop.eup %1522  ;;  %1548 = vtanh.f32 %v626_v31  ;;  %v628_v40 = vadd.f32 %v627_v35, %v1994_v58 }
 0x123   : > { %v821_v41 = vadd.f32 %v820_v37, %v1996_v59  ;;  %v2084_v43 = vpop.eup %1524  ;;  %1550 = vtanh.f32 %v819_v32  ;;  %v629_v44 = vpop.f32.mrf.mxu0 }
 0x124   : > { %v822_v46 = vpop.f32.mrf.mxu1  ;;  %v2086_v47 = vpop.eup %1526  ;;  %1552 = vtanh.f32 %v628_v40  ;;  %v630_v49 = vadd.f32 %v629_v44, %v1998_v60 }
 0x125   : > { %v823_v50 = vadd.f32 %v822_v46, %v2000_v61  ;;  %v2090_v54 = vpop.eup %1528  ;;  %1554 = vtanh.f32 %v821_v41  ;;  %v633_v55 = vpop.f32.mrf.mxu0 }
 0x126   : > { %v826_v57 = vpop.f32.mrf.mxu1  ;;  %v2092_v62 = vpop.eup %1530  ;;  %1556 = vtanh.f32 %v630_v49  ;;  %v634_v0 = vadd.f32 %v633_v55, %v1994_v58 }
 0x127   : > { %v827_v1 = vadd.f32 %v826_v57, %v1996_v59  ;;  %v2096_v3 = vpop.eup %1532  ;;  %1558 = vtanh.f32 %v823_v50  ;;  %v635_v4 = vpop.f32.mrf.mxu0 }
 0x128   : > { %v828_v6 = vpop.f32.mrf.mxu1  ;;  %v2098_v7 = vpop.eup %1534  ;;  %1560 = vtanh.f32 %v634_v0  ;;  %v636_v9 = vadd.f32 %v635_v4, %v1998_v60 }
 0x129   : > { %v829_v10 = vadd.f32 %v828_v6, %v2000_v61  ;;  %v2102_v12 = vpop.eup %1536  ;;  %1562 = vtanh.f32 %v827_v1  ;;  %v637_v13 = vpop.f32.mrf.mxu0 }
 0x12a   : > { %v830_v15 = vpop.f32.mrf.mxu1  ;;  %v2104_v16 = vpop.eup %1538  ;;  %1564 = vtanh.f32 %v636_v9  ;;  %v638_v18 = vadd.f32 %v637_v13, %v1994_v58 }
 0x12b   : > { %v831_v19 = vadd.f32 %v830_v15, %v1996_v59  ;;  %v2108_v21 = vpop.eup %1540  ;;  %1566 = vtanh.f32 %v829_v10  ;;  %v639_v22 = vpop.f32.mrf.mxu0 }
 0x12c   : > { %v832_v24 = vpop.f32.mrf.mxu1  ;;  %v2110_v25 = vpop.eup %1542  ;;  %1568 = vtanh.f32 %v638_v18  ;;  %v640_v27 = vadd.f32 %v639_v22, %v1998_v60 }
 0x12d   : > { %v833_v28 = vadd.f32 %v832_v24, %v2000_v61  ;;  %v2114_v31 = vpop.eup %1544  ;;  %1570 = vtanh.f32 %v831_v19  ;;  %v643_v32 = vpop.f32.mrf.mxu0 }
 0x12e   : > { %v836_v35 = vpop.f32.mrf.mxu1  ;;  %v2116_v37 = vpop.eup %1546  ;;  %1572 = vtanh.f32 %v640_v27  ;;  %v644_v40 = vadd.f32 %v643_v32, %v1994_v58 }
 0x12f   : > { %v837_v41 = vadd.f32 %v836_v35, %v1996_v59  ;;  %v2120_v44 = vpop.eup %1548  ;;  %1574 = vtanh.f32 %v833_v28  ;;  %v645_v46 = vpop.f32.mrf.mxu0 }
 0x130   : > { %v838_v49 = vpop.f32.mrf.mxu1  ;;  %v2122_v50 = vpop.eup %1550  ;;  %1576 = vtanh.f32 %v644_v40  ;;  %v646_v55 = vadd.f32 %v645_v46, %v1998_v60 }
 0x131   : > { %v839_v57 = vadd.f32 %v838_v49, %v2000_v61  ;;  %v2126_v0 = vpop.eup %1552  ;;  %1578 = vtanh.f32 %v837_v41  ;;  %v647_v1 = vpop.f32.mrf.mxu0 }
 0x132   : > { %v840_v4 = vpop.f32.mrf.mxu1  ;;  %v2128_v6 = vpop.eup %1554  ;;  %1580 = vtanh.f32 %v646_v55  ;;  %v648_v9 = vadd.f32 %v647_v1, %v1994_v58 }
 0x133   : > { %v841_v10 = vadd.f32 %v840_v4, %v1996_v59  ;;  %v2132_v13 = vpop.eup %1556  ;;  %1582 = vtanh.f32 %v839_v57  ;;  %v649_v15 = vpop.f32.mrf.mxu0 }
 0x134   : > { %v842_v18 = vpop.f32.mrf.mxu1  ;;  %v2134_v19 = vpop.eup %1558  ;;  %1584 = vtanh.f32 %v648_v9  ;;  %v650_v22 = vadd.f32 %v649_v15, %v1998_v60 }
 0x135   : > { %v843_v24 = vadd.f32 %v842_v18, %v2000_v61  ;;  %v2138_v27 = vpop.eup %1560  ;;  %1586 = vtanh.f32 %v841_v10  ;;  %v653_v28 = vpop.f32.mrf.mxu0 }
 0x136   : > { %v846_v32 = vpop.f32.mrf.mxu1  ;;  %v2140_v35 = vpop.eup %1562  ;;  %1588 = vtanh.f32 %v650_v22  ;;  %v654_v40 = vadd.f32 %v653_v28, %v1994_v58 }
 0x137   : > { %v847_v41 = vadd.f32 %v846_v32, %v1996_v59  ;;  %v2144_v46 = vpop.eup %1564  ;;  %1590 = vtanh.f32 %v843_v24  ;;  %v655_v49 = vpop.f32.mrf.mxu0 }
 0x138   : > { %v848_v55 = vpop.f32.mrf.mxu1  ;;  %v2146_v57 = vpop.eup %1566  ;;  %1592 = vtanh.f32 %v654_v40  ;;  %v656_v1 = vadd.f32 %v655_v49, %v1998_v60 }
 0x139   : > { %v849_v4 = vadd.f32 %v848_v55, %v2000_v61  ;;  %v2150_v9 = vpop.eup %1568  ;;  %1594 = vtanh.f32 %v847_v41  ;;  %v657_v10 = vpop.f32.mrf.mxu0 }
 0x13a   : > { %v850_v15 = vpop.f32.mrf.mxu1  ;;  %v2152_v18 = vpop.eup %1570  ;;  %1596 = vtanh.f32 %v656_v1  ;;  %v658_v22 = vadd.f32 %v657_v10, %v1994_v58 }
 0x13b   : > { %v851_v24 = vadd.f32 %v850_v15, %v1996_v59  ;;  %v2156_v28 = vpop.eup %1572  ;;  %1598 = vtanh.f32 %v849_v4  ;;  %v659_v32 = vpop.f32.mrf.mxu0 }
 0x13c   : > { %2468 = vst [vmem:[#allocation3_spill] sm:$0xff] %v2156_v28  ;;  %v852_v40 = vpop.f32.mrf.mxu1  ;;  %v2158_v49 = vpop.eup %1574  ;;  %1600 = vtanh.f32 %v658_v22  ;;  %v660_v55 = vadd.f32 %v659_v32, %v1998_v60 }
 0x13d   : > { %2469 = vst [vmem:[#allocation4_spill] sm:$0xff] %v2158_v49  ;;  %v853_v41 = vadd.f32 %v852_v40, %v2000_v61  ;;  %v2162_v51 = vpop.eup %1576  ;;  %1602 = vtanh.f32 %v851_v24  ;;  %v663_v1 = vpop.f32.mrf.mxu0 }
 0x13e   : > { %2470 = vst [vmem:[#allocation5_spill] sm:$0xff] %v2162_v51  ;;  %v856_v52 = vpop.f32.mrf.mxu1  ;;  %v2164_v10 = vpop.eup %1578  ;;  %1604 = vtanh.f32 %v660_v55  ;;  %v664_v15 = vadd.f32 %v663_v1, %v1994_v58 }
 0x13f   : > { %2471 = vst [vmem:[#allocation6_spill] sm:$0xff] %v2164_v10  ;;  %v857_v4 = vadd.f32 %v856_v52, %v1996_v59  ;;  %v2168_v28 = vpop.eup %1580  ;;  %1606 = vtanh.f32 %v853_v41  ;;  %v665_v22 = vpop.f32.mrf.mxu0 }
 0x140   : > { %2472 = vst [vmem:[#allocation7_spill] sm:$0xff] %v2168_v28  ;;  %v858_v49 = vpop.f32.mrf.mxu1  ;;  %v2170_v32 = vpop.eup %1582  ;;  %1608 = vtanh.f32 %v664_v15  ;;  %v666_v40 = vadd.f32 %v665_v22, %v1998_v60 }
 0x141   : > { %2473 = vst [vmem:[#allocation8_spill] sm:$0xff] %v2170_v32  ;;  %v859_v24 = vadd.f32 %v858_v49, %v2000_v61  ;;  %v2174_v51 = vpop.eup %1584  ;;  %1610 = vtanh.f32 %v857_v4  ;;  %v667_v55 = vpop.f32.mrf.mxu0 }
 0x142   : > { %2474 = vst [vmem:[#allocation9_spill] sm:$0xff] %v2174_v51  ;;  %v860_v10 = vpop.f32.mrf.mxu1  ;;  %v2176_v1 = vpop.eup %1586  ;;  %1612 = vtanh.f32 %v666_v40  ;;  %v668_v52 = vadd.f32 %v667_v55, %v1994_v58 }
 0x143   : > { %2475 = vst [vmem:[#allocation10_spill] sm:$0xff] %v2176_v1  ;;  %v861_v41 = vadd.f32 %v860_v10, %v1996_v59  ;;  %v2180_v28 = vpop.eup %1588  ;;  %1614 = vtanh.f32 %v859_v24  ;;  %v669_v15 = vpop.f32.mrf.mxu0 }
 0x144   : > { %2476 = vst [vmem:[#allocation11_spill] sm:$0xff] %v2180_v28  ;;  %v862_v32 = vpop.f32.mrf.mxu1  ;;  %v2182_v22 = vpop.eup %1590  ;;  %1616 = vtanh.f32 %v668_v52  ;;  %v670_v49 = vadd.f32 %v669_v15, %v1998_v60 }
 0x145   : > { %2477 = vst [vmem:[#allocation12_spill] sm:$0xff] %v2182_v22  ;;  %v863_v4 = vadd.f32 %v862_v32, %v2000_v61  ;;  %v2186_v51 = vpop.eup %1592  ;;  %1618 = vtanh.f32 %v861_v41  ;;  %v673_v40 = vpop.f32.mrf.mxu0 }
 0x146   : > { %2478 = vst [vmem:[#allocation13_spill] sm:$0xff] %v2186_v51  ;;  %v866_v1 = vpop.f32.mrf.mxu1  ;;  %v2188_v55 = vpop.eup %1594  ;;  %1620 = vtanh.f32 %v670_v49  ;;  %v674_v10 = vadd.f32 %v673_v40, %v1994_v58 }
 0x147   : > { %2479 = vst [vmem:[#allocation14_spill] sm:$0xff] %v2188_v55  ;;  %v867_v24 = vadd.f32 %v866_v1, %v1996_v59  ;;  %v2192_v28 = vpop.eup %1596  ;;  %1622 = vtanh.f32 %v863_v4  ;;  %v675_v52 = vpop.f32.mrf.mxu0 }
 0x148   : > { %2480 = vst [vmem:[#allocation15_spill] sm:$0xff] %v2192_v28  ;;  %v868_v22 = vpop.f32.mrf.mxu1  ;;  %v2194_v15 = vpop.eup %1598  ;;  %1624 = vtanh.f32 %v674_v10  ;;  %v676_v32 = vadd.f32 %v675_v52, %v1998_v60 }
 0x149   : > { %2481 = vst [vmem:[#allocation16_spill] sm:$0xff] %v2194_v15  ;;  %v869_v41 = vadd.f32 %v868_v22, %v2000_v61  ;;  %v2198_v51 = vpop.eup %1600  ;;  %1626 = vtanh.f32 %v867_v24  ;;  %v677_v49 = vpop.f32.mrf.mxu0 }
 0x14a   : > { %2482 = vst [vmem:[#allocation17_spill] sm:$0xff] %v2198_v51  ;;  %v870_v55 = vpop.f32.mrf.mxu1  ;;  %v2200_v40 = vpop.eup %1602  ;;  %1628 = vtanh.f32 %v676_v32  ;;  %v678_v1 = vadd.f32 %v677_v49, %v1994_v58 }
 0x14b   : > { %2483 = vst [vmem:[#allocation18_spill] sm:$0xff] %v2200_v40  ;;  %v871_v4 = vadd.f32 %v870_v55, %v1996_v59  ;;  %v2204_v28 = vpop.eup %1604  ;;  %1630 = vtanh.f32 %v869_v41  ;;  %v679_v10 = vpop.f32.mrf.mxu0  ;;  %v1064_v55 = vadd.f32 %v2030_v42, %v2018_v30 }
 0x14c   : > { %v872_v15 = vpop.f32.mrf.mxu1  ;;  %v2206_v52 = vpop.eup %1606  ;;  %1632 = vtanh.f32 %v678_v1  ;;  %v680_v22 = vadd.f32 %v679_v10, %v1998_v60 }
 0x14d   : > { %2484 = vst [vmem:[#allocation19_spill] sm:$0xff] %v2206_v52  ;;  %v873_v24 = vadd.f32 %v872_v15, %v2000_v61  ;;  %v2210_v51 = vpop.eup %1608  ;;  %1634 = vtanh.f32 %v871_v4  ;;  %v683_v32 = vpop.f32.mrf.mxu0  ;;  %v1138_v15 = vadd.f32 %v2032_v45, %v2020_v33  ;;  %v1101_v4 = vadd.f32 %v2036_v48, %v2024_v36 }
 0x14e   : > { %2485 = vst [vmem:[#allocation20_spill] sm:$0xff] %v2210_v51  ;;  %v876_v40 = vpop.f32.mrf.mxu1  ;;  %v2212_v49 = vpop.eup %1610  ;;  %1636 = vtanh.f32 %v680_v22  ;;  %v684_v41 = vadd.f32 %v683_v32, %v1994_v58  ;;  %v1065_v30 = vadd.f32 %v2042_v56, %v1064_v55  ;;  %v1175_v33 = vadd.f32 %v2038_v53, %v2026_v39 }
 0x14f   : > { %2486 = vst [vmem:[#allocation21_spill] sm:$0xff] %v2212_v49  ;;  %v877_v52 = vadd.f32 %v876_v40, %v1996_v59  ;;  %v2218_v1 = vpop.eup %1612  ;;  %1638 = vtanh.f32 %v873_v24  ;;  %v685_v10 = vpop.f32.mrf.mxu0  ;;  %v1139_v45 = vadd.f32 %v2044_v63, %v1138_v15  ;;  %v1102_v36 = vadd.f32 %v2048_v2, %v1101_v4 }
 0x150   : > { %v878_v51 = vpop.f32.mrf.mxu1  ;;  %v2224_v49 = vpop.eup %1614  ;;  %1640 = vtanh.f32 %v684_v41  ;;  %v686_v42 = vadd.f32 %v685_v10, %v1998_v60  ;;  %v1066_v56 = vadd.f32 %v2054_v8, %v1065_v30  ;;  %v1176_v39 = vadd.f32 %v2050_v5, %v1175_v33 }
 0x151   : > { %v879_v40 = vadd.f32 %v878_v51, %v2000_v61  ;;  %v2229_v22 = vpop.eup %1616  ;;  %1642 = vtanh.f32 %v877_v52  ;;  %v687_v48 = vpop.f32.mrf.mxu0  ;;  %v1140_v53 = vadd.f32 %v2056_v11, %v1139_v45  ;;  %v1103_v63 = vadd.f32 %v2060_v14, %v1102_v36 }
 0x152   : > { %v880_v24 = vpop.f32.mrf.mxu1  ;;  %v2235_v32 = vpop.eup %1618  ;;  %1644 = vtanh.f32 %v686_v42  ;;  %v688_v55 = vadd.f32 %v687_v48, %v1994_v58  ;;  %v1067_v8 = vadd.f32 %v2066_v20, %v1066_v56  ;;  %v1177_v5 = vadd.f32 %v2062_v17, %v1176_v39 }
 0x153   : > { %v881_v51 = vadd.f32 %v880_v24, %v1996_v59  ;;  %v2240_v41 = vpop.eup %1620  ;;  %1646 = vtanh.f32 %v879_v40  ;;  %v689_v2 = vpop.f32.mrf.mxu0  ;;  %v1141_v11 = vadd.f32 %v2068_v23, %v1140_v53  ;;  %v1104_v14 = vadd.f32 %v2072_v26, %v1103_v63 }
 0x154   : > { %v882_v52 = vpop.f32.mrf.mxu1  ;;  %v2245_v15 = vpop.eup %1622  ;;  %1648 = vtanh.f32 %v688_v55  ;;  %v690_v4 = vadd.f32 %v689_v2, %v1998_v60  ;;  %v1068_v20 = vadd.f32 %v2078_v34, %v1067_v8  ;;  %v1178_v17 = vadd.f32 %v2074_v29, %v1177_v5 }
 0x155   : > { %v883_v10 = vadd.f32 %v882_v52, %v2000_v61  ;;  %v2250_v30 = vpop.eup %1624  ;;  %1650 = vtanh.f32 %v881_v51  ;;  %v693_v42 = vpop.f32.mrf.mxu0  ;;  %v1142_v23 = vadd.f32 %v2080_v38, %v1141_v11  ;;  %v1105_v26 = vadd.f32 %v2084_v43, %v1104_v14 }
 0x156   : > { %v886_v40 = vpop.f32.mrf.mxu1  ;;  %v2255_v33 = vpop.eup %1626  ;;  %1652 = vtanh.f32 %v690_v4  ;;  %v694_v45 = vadd.f32 %v693_v42, %v1994_v58  ;;  %v1069_v34 = vadd.f32 %v2090_v54, %v1068_v20  ;;  %v1179_v29 = vadd.f32 %v2086_v47, %v1178_v17 }
 0x157   : > { %v887_v36 = vadd.f32 %v886_v40, %v1996_v59  ;;  %v2260_v48 = vpop.eup %1628  ;;  %1654 = vtanh.f32 %v883_v10  ;;  %v695_v24 = vpop.f32.mrf.mxu0  ;;  %v1143_v38 = vadd.f32 %v2092_v62, %v1142_v23  ;;  %v1106_v43 = vadd.f32 %v2096_v3, %v1105_v26 }
 0x158   : > { %v888_v56 = vpop.f32.mrf.mxu1  ;;  %v2265_v55 = vpop.eup %1630  ;;  %1656 = vtanh.f32 %v694_v45  ;;  %v696_v51 = vadd.f32 %v695_v24, %v1998_v60  ;;  %v1070_v54 = vadd.f32 %v2102_v12, %v1069_v34  ;;  %v1180_v47 = vadd.f32 %v2098_v7, %v1179_v29 }
 0x159   : > { %v889_v39 = vadd.f32 %v888_v56, %v2000_v61  ;;  %v2270_v53 = vpop.eup %1632  ;;  %1658 = vtanh.f32 %v887_v36  ;;  %v697_v63 = vpop.f32.mrf.mxu0  ;;  %v1144_v62 = vadd.f32 %v2104_v16, %v1143_v38  ;;  %v1107_v3 = vadd.f32 %v2108_v21, %v1106_v43 }
 0x15a   : > { %v890_v2 = vpop.f32.mrf.mxu1  ;;  %v2275_v52 = vpop.eup %1634  ;;  %1660 = vtanh.f32 %v696_v51  ;;  %v698_v8 = vadd.f32 %v697_v63, %v1994_v58  ;;  %v1071_v12 = vadd.f32 %v2114_v31, %v1070_v54  ;;  %v1181_v7 = vadd.f32 %v2110_v25, %v1180_v47  ;;  %v2487_v47 = vld [vmem:[#allocation3_spill] sm:$0xff] }
 0x15b   : > { %v891_v4 = vadd.f32 %v890_v2, %v1996_v59  ;;  %v2280_v10 = vpop.eup %1636  ;;  %1662 = vtanh.f32 %v889_v39  ;;  %v699_v5 = vpop.f32.mrf.mxu0  ;;  %v1145_v16 = vadd.f32 %v2116_v37, %v1144_v62  ;;  %v1108_v21 = vadd.f32 %v2120_v44, %v1107_v3 }
 0x15c   : > { %v892_v11 = vpop.f32.mrf.mxu1  ;;  %v2285_v14 = vpop.eup %1638  ;;  %1664 = vtanh.f32 %v698_v8  ;;  %v700_v42 = vadd.f32 %v699_v5, %v1998_v60  ;;  %v1072_v31 = vadd.f32 %v2126_v0, %v1071_v12  ;;  %v1182_v25 = vadd.f32 %v2122_v50, %v1181_v7  ;;  %v2489_v7 = vld [vmem:[#allocation4_spill] sm:$0xff] }
 0x15d   : > { %v893_v40 = vadd.f32 %v892_v11, %v2000_v61  ;;  %v2290_v20 = vpop.eup %1640  ;;  %1666 = vtanh.f32 %v891_v4  ;;  %v703_v45 = vpop.f32.mrf.mxu0  ;;  %v1146_v37 = vadd.f32 %v2128_v6, %v1145_v16  ;;  %v1109_v44 = vadd.f32 %v2132_v13, %v1108_v21  ;;  %v2488_v11 = vld [vmem:[#allocation5_spill] sm:$0xff]  ;;  %v2490_v16 = vld [vmem:[#allocation6_spill] sm:$0xff]  ;;  %v2491_v21 = vld [vmem:[#allocation7_spill] sm:$0xff] }
 0x15e   : > { %v896_v36 = vpop.f32.mrf.mxu1  ;;  %v2295_v17 = vpop.eup %1642  ;;  %1668 = vtanh.f32 %v700_v42  ;;  %v704_v23 = vadd.f32 %v703_v45, %v1994_v58  ;;  %v1073_v0 = vadd.f32 %v2138_v27, %v1072_v31  ;;  %v1183_v50 = vadd.f32 %v2134_v19, %v1182_v25 }
 0x15f   : > { %v897_v26 = vadd.f32 %v896_v36, %v1996_v59  ;;  %v2300_v24 = vpop.eup %1644  ;;  %1670 = vtanh.f32 %v893_v40  ;;  %v705_v56 = vpop.f32.mrf.mxu0  ;;  %v1147_v6 = vadd.f32 %v2140_v35, %v1146_v37  ;;  %v1110_v13 = vadd.f32 %v2144_v46, %v1109_v44 }
 0x160   : > { %v898_v34 = vpop.f32.mrf.mxu1  ;;  %v2305_v51 = vpop.eup %1646  ;;  %1672 = vtanh.f32 %v704_v23  ;;  %v706_v39 = vadd.f32 %v705_v56, %v1998_v60  ;;  %v1074_v27 = vadd.f32 %v2150_v9, %v1073_v0  ;;  %v1184_v19 = vadd.f32 %v2146_v57, %v1183_v50  ;;  %v2495_v50 = vld [vmem:[#allocation11_spill] sm:$0xff] }
 0x161   : > { %v899_v29 = vadd.f32 %v898_v34, %v2000_v61  ;;  %v2310_v38 = vpop.eup %1648  ;;  %1674 = vtanh.f32 %v897_v26  ;;  %v707_v43 = vpop.f32.mrf.mxu0  ;;  %v1148_v35 = vadd.f32 %v2152_v18, %v1147_v6  ;;  %v1111_v46 = vadd.f32 %v2487_v47, %v1110_v13  ;;  %v2492_v26 = vld [vmem:[#allocation9_spill] sm:$0xff]  ;;  %v2493_v34 = vld [vmem:[#allocation8_spill] sm:$0xff] }
 0x162   : > { %v900_v63 = vpop.f32.mrf.mxu1  ;;  %v2315_v2 = vpop.eup %1650  ;;  %1676 = vtanh.f32 %v706_v39  ;;  %v708_v54 = vadd.f32 %v707_v43, %v1994_v58  ;;  %v1075_v9 = vadd.f32 %v2488_v11, %v1074_v27  ;;  %v1185_v57 = vadd.f32 %v2489_v7, %v1184_v19  ;;  %v2494_v39 = vld [vmem:[#allocation10_spill] sm:$0xff]  ;;  %v2496_v27 = vld [vmem:[#allocation13_spill] sm:$0xff]  ;;  %v2497_v47 = vld [vmem:[#allocation12_spill] sm:$0xff] }
 0x163   : > { %v901_v8 = vadd.f32 %v900_v63, %v1996_v59  ;;  %v2320_v4 = vpop.eup %1652  ;;  %1678 = vtanh.f32 %v899_v29  ;;  %v709_v62 = vpop.f32.mrf.mxu0  ;;  %v1149_v18 = vadd.f32 %v2490_v16, %v1148_v35  ;;  %v1112_v45 = vadd.f32 %v2491_v21, %v1111_v46  ;;  %v2499_v11 = vld [vmem:[#allocation15_spill] sm:$0xff] }
 0x164   : > { %v902_v3 = vpop.f32.mrf.mxu1  ;;  %v2325_v5 = vpop.eup %1654  ;;  %1680 = vtanh.f32 %v708_v54  ;;  %v710_v12 = vadd.f32 %v709_v62, %v1998_v60  ;;  %v1076_v25 = vadd.f32 %v2492_v26, %v1075_v9  ;;  %v1186_v0 = vadd.f32 %v2493_v34, %v1185_v57  ;;  %v2498_v62 = vld [vmem:[#allocation14_spill] sm:$0xff]  ;;  %v2500_v57 = vld [vmem:[#allocation17_spill] sm:$0xff] }
 0x165   : > { %v903_v42 = vadd.f32 %v902_v3, %v2000_v61  ;;  %v2330_v40 = vpop.eup %1656  ;;  %1682 = vtanh.f32 %v901_v8  ;;  %v713_v36 = vpop.f32.mrf.mxu0  ;;  %v1150_v29 = vadd.f32 %v2494_v39, %v1149_v18  ;;  %v1113_v6 = vadd.f32 %v2495_v50, %v1112_v45  ;;  %v2502_v26 = vld [vmem:[#allocation18_spill] sm:$0xff]  ;;  %v2503_v39 = vld [vmem:[#allocation20_spill] sm:$0xff] }
 0x166   : > { %v906_v31 = vpop.f32.mrf.mxu1  ;;  %v2335_v23 = vpop.eup %1658  ;;  %1684 = vtanh.f32 %v710_v12  ;;  %v714_v37 = vadd.f32 %v713_v36, %v1994_v58  ;;  %v1077_v54 = vadd.f32 %v2496_v27, %v1076_v25  ;;  %v1187_v46 = vadd.f32 %v2497_v47, %v1186_v0  ;;  %v2501_v36 = vld [vmem:[#allocation16_spill] sm:$0xff] }
 0x167   : > { %v907_v44 = vadd.f32 %v906_v31, %v1996_v59  ;;  %v2340_v56 = vpop.eup %1660  ;;  %1686 = vtanh.f32 %v903_v42  ;;  %v715_v13 = vpop.f32.mrf.mxu0  ;;  %v1151_v3 = vadd.f32 %v2498_v62, %v1150_v29  ;;  %v1114_v9 = vadd.f32 %v2499_v11, %v1113_v6 }
 0x168   : > { %v908_v43 = vpop.f32.mrf.mxu1  ;;  %v2345_v63 = vpop.eup %1662  ;;  %1688 = vtanh.f32 %v714_v37  ;;  %v716_v8 = vadd.f32 %v715_v13, %v1998_v60  ;;  %v1078_v16 = vadd.f32 %v2500_v57, %v1077_v54  ;;  %v1188_v31 = vadd.f32 %v2501_v36, %v1187_v46  ;;  %v2505_v54 = vld [vmem:[#allocation21_spill] sm:$0xff] }
 0x169   : > { %v909_v19 = vadd.f32 %v908_v43, %v2000_v61  ;;  %v2350_v35 = vpop.eup %1664  ;;  %1690 = vtanh.f32 %v907_v44  ;;  %v717_v12 = vpop.f32.mrf.mxu0  ;;  %v1152_v25 = vadd.f32 %v2502_v26, %v1151_v3  ;;  %v1115_v37 = vadd.f32 %v2204_v28, %v1114_v9  ;;  %v2504_v43 = vld [vmem:[#allocation19_spill] sm:$0xff] }
 0x16a   : > { %v910_v42 = vpop.f32.mrf.mxu1  ;;  %v2355_v7 = vpop.eup %1666  ;;  %1692 = vtanh.f32 %v716_v8  ;;  %v718_v18 = vadd.f32 %v717_v12, %v1994_v58  ;;  %v1079_v29 = vadd.f32 %v2503_v39, %v1078_v16  ;;  %v1189_v27 = vadd.f32 %v2504_v43, %v1188_v31 }
 0x16b   : > { %v911_v21 = vadd.f32 %v910_v42, %v1996_v59  ;;  %v2360_v45 = vpop.eup %1668  ;;  %1694 = vtanh.f32 %v909_v19  ;;  %v719_v44 = vpop.f32.mrf.mxu0  ;;  %v1153_v8 = vadd.f32 %v2505_v54, %v1152_v25  ;;  %v1116_v28 = vadd.f32 %v2218_v1, %v1115_v37 }
 0x16c   : > { %v912_v34 = vpop.f32.mrf.mxu1  ;;  %v2365_v0 = vpop.eup %1670  ;;  %1696 = vtanh.f32 %v718_v18  ;;  %v720_v50 = vadd.f32 %v719_v44, %v1998_v60  ;;  %v1080_v62 = vadd.f32 %v2229_v22, %v1079_v29  ;;  %v1190_v12 = vadd.f32 %v2224_v49, %v1189_v27 }
 0x16d   : > { %v913_v6 = vadd.f32 %v912_v34, %v2000_v61  ;;  %v2370_v13 = vpop.eup %1672  ;;  %1698 = vtanh.f32 %v911_v21  ;;  %v723_v19 = vpop.f32.mrf.mxu0  ;;  %v1154_v42 = vadd.f32 %v2235_v32, %v1153_v8  ;;  %v1117_v1 = vadd.f32 %v2240_v41, %v1116_v28 }
 0x16e   : > { %v916_v47 = vpop.f32.mrf.mxu1  ;;  %v2375_v46 = vpop.eup %1674  ;;  %1700 = vtanh.f32 %v720_v50  ;;  %v724_v3 = vadd.f32 %v723_v19, %v1994_v58  ;;  %v1081_v22 = vadd.f32 %v2250_v30, %v1080_v62  ;;  %v1191_v49 = vadd.f32 %v2245_v15, %v1190_v12 }
 0x16f   : > { %v917_v11 = vadd.f32 %v916_v47, %v1996_v59  ;;  %v2380_v9 = vpop.eup %1676  ;;  %1702 = vtanh.f32 %v913_v6  ;;  %v725_v57 = vpop.f32.mrf.mxu0  ;;  %v1155_v32 = vadd.f32 %v2255_v33, %v1154_v42  ;;  %v1118_v41 = vadd.f32 %v2260_v48, %v1117_v1 }
 0x170   : > { %v918_v16 = vpop.f32.mrf.mxu1  ;;  %v2385_v18 = vpop.eup %1678  ;;  %1704 = vtanh.f32 %v724_v3  ;;  %v726_v21 = vadd.f32 %v725_v57, %v1998_v60  ;;  %v1082_v30 = vadd.f32 %v2270_v53, %v1081_v22  ;;  %v1192_v15 = vadd.f32 %v2265_v55, %v1191_v49 }
 0x171   : > { %v919_v36 = vadd.f32 %v918_v16, %v2000_v61  ;;  %v2390_v31 = vpop.eup %1680  ;;  %1706 = vtanh.f32 %v917_v11  ;;  %v727_v26 = vpop.f32.mrf.mxu0  ;;  %v1156_v33 = vadd.f32 %v2275_v52, %v1155_v32  ;;  %v1119_v48 = vadd.f32 %v2280_v10, %v1118_v41 }
 0x172   : > { %v920_v25 = vpop.f32.mrf.mxu1  ;;  %v2395_v37 = vpop.eup %1682  ;;  %1708 = vtanh.f32 %v726_v21  ;;  %v728_v44 = vadd.f32 %v727_v26, %v1994_v58  ;;  %v1083_v53 = vadd.f32 %v2290_v20, %v1082_v30  ;;  %v1193_v8 = vadd.f32 %v2285_v14, %v1192_v15 }
 0x173   : > { %v921_v34 = vadd.f32 %v920_v25, %v1996_v59  ;;  %v2400_v39 = vpop.eup %1684  ;;  %1710 = vtanh.f32 %v919_v36  ;;  %v729_v29 = vpop.f32.mrf.mxu0  ;;  %v1157_v55 = vadd.f32 %v2295_v17, %v1156_v33  ;;  %v1120_v52 = vadd.f32 %v2300_v24, %v1119_v48 }
 0x174   : > { %v922_v50 = vpop.f32.mrf.mxu1  ;;  %v2405_v6 = vpop.eup %1686  ;;  %1712 = vtanh.f32 %v728_v44  ;;  %v730_v43 = vadd.f32 %v729_v29, %v1998_v60  ;;  %v1084_v47 = vadd.f32 %v2310_v38, %v1083_v53  ;;  %v1194_v11 = vadd.f32 %v2305_v51, %v1193_v8 }
 0x175   : > { %v923_v27 = vadd.f32 %v922_v50, %v2000_v61  ;;  %v1689_v54 = vpop.eup %1688  ;;  %1714 = vtanh.f32 %v921_v34  ;;  %v733_v10 = vpop.f32.mrf.mxu0  ;;  %v1158_v14 = vadd.f32 %v2315_v2, %v1157_v55  ;;  %v1121_v17 = vadd.f32 %v2320_v4, %v1120_v52 }
 0x176   : > { %v926_v28 = vpop.f32.mrf.mxu1  ;;  %v1691_v19 = vpop.eup %1690  ;;  %1716 = vtanh.f32 %v730_v43  ;;  %v734_v20 = vadd.f32 %v733_v10, %v1994_v58  ;;  %v1085_v1 = vadd.f32 %v2330_v40, %v1084_v47  ;;  %v1195_v22 = vadd.f32 %v2325_v5, %v1194_v11 }
 0x177   : > { %v927_v62 = vadd.f32 %v926_v28, %v1996_v59  ;;  %v1693_v3 = vpop.eup %1692  ;;  %1718 = vtanh.f32 %v923_v27  ;;  %v735_v24 = vpop.f32.mrf.mxu0  ;;  %v1159_v51 = vadd.f32 %v2335_v23, %v1158_v14  ;;  %v1122_v2 = vadd.f32 %v2340_v56, %v1121_v17 }
 0x178   : > { %v928_v12 = vpop.f32.mrf.mxu1  ;;  %v1695_v42 = vpop.eup %1694  ;;  %1720 = vtanh.f32 %v734_v20  ;;  %v736_v38 = vadd.f32 %v735_v24, %v1998_v60  ;;  %v1086_v49 = vadd.f32 %v2350_v35, %v1085_v1  ;;  %v1196_v26 = vadd.f32 %v2345_v63, %v1195_v22 }
 0x179   : > { %v929_v57 = vadd.f32 %v928_v12, %v2000_v61  ;;  %v1697_v16 = vpop.eup %1696  ;;  %1722 = vtanh.f32 %v927_v62  ;;  %v737_v4 = vpop.f32.mrf.mxu0  ;;  %v1160_v5 = vadd.f32 %v2355_v7, %v1159_v51  ;;  %v1123_v23 = vadd.f32 %v2360_v45, %v1122_v2 }
 0x17a   : > { %v930_v21 = vpop.f32.mrf.mxu1  ;;  %v1699_v36 = vpop.eup %1698  ;;  %1724 = vtanh.f32 %v736_v38  ;;  %v738_v40 = vadd.f32 %v737_v4, %v1994_v58  ;;  %v1087_v44 = vadd.f32 %v2370_v13, %v1086_v49 }
 0x17b   : > { %v931_v32 = vadd.f32 %v930_v21, %v1996_v59  ;;  %v1701_v41 = vpop.eup %1700  ;;  %1726 = vtanh.f32 %v929_v57  ;;  %v739_v56 = vpop.f32.mrf.mxu0  ;;  %v1197_v59 = vadd.f32 %v2365_v0, %v1196_v26  ;;  %v1161_v63 = vadd.f32 %v2375_v46, %v1160_v5 }
 0x17c   : > { %v932_v25 = vpop.f32.mrf.mxu1  ;;  %v1703_v30 = vpop.eup %1702  ;;  %1728 = vtanh.f32 %v738_v40  ;;  %v740_v35 = vadd.f32 %v739_v56, %v1998_v60  ;;  %v1124_v45 = vadd.f32 %v2380_v9, %v1123_v23  ;;  %v1088_v15 = vadd.f32 %v2390_v31, %v1087_v44 }
 0x17d   : > { %v933_v58 = vadd.f32 %v932_v25, %v2000_v61  ;;  %v1705_v34 = vpop.eup %1704  ;;  %1730 = vtanh.f32 %v931_v32  ;;  %v1198_v13 = vadd.f32 %v2385_v18, %v1197_v59  ;;  %v1162_v48 = vadd.f32 %v2395_v37, %v1161_v63 }
 0x17e   : > { %v1707_v7 = vpop.eup %1706  ;;  %1732 = vtanh.f32 %v740_v35  ;;  %v1125_v61 = vadd.f32 %v2400_v39, %v1124_v45  ;;  %v1089_v29 = vadd.f32 %v1689_v54, %v1088_v15  ;;  %v1778_v5 = vmov 1966171168  }
 0x17f   : > { %v1709_v33 = vpop.eup %1708  ;;  %1734 = vtanh.f32 %v933_v58  ;;  %v1199_v46 = vadd.f32 %v2405_v6, %v1198_v13  ;;  %v1163_v50 = vadd.f32 %v1691_v19, %v1162_v48  ;;  %v1219_v23 = vunpack.c.l.s4 %v1778_v5 }
 0x180   : > { %v1711_v60 = vpop.eup %1710  ;;  %v1126_v43 = vadd.f32 %v1693_v3, %v1125_v61  ;;  %v1090_v9 = vadd.f32 %v1697_v16, %v1089_v29 }
 0x181   : > { %v1713_v0 = vpop.eup %1712  ;;  %v1200_v31 = vadd.f32 %v1695_v42, %v1199_v46  ;;  %v1164_v8 = vadd.f32 %v1699_v36, %v1163_v50  ;;  %v1220_v63 = vunpack.c.0.s8 %v1219_v23 }
 0x182   : > { %v1715_v53 = vpop.eup %1714  ;;  %v1127_v52 = vadd.f32 %v1701_v41, %v1126_v43  ;;  %v1091_v18 = vadd.f32 %v1705_v34, %v1090_v9 }
 0x183   : > { %v1717_v27 = vpop.eup %1716  ;;  %v1201_v37 = vadd.f32 %v1703_v30, %v1200_v31  ;;  %v1165_v28 = vadd.f32 %v1707_v7, %v1164_v8  ;;  %v2507_v8 = vlaneseq }
 0x184   : > { %v1719_v55 = vpop.eup %1718  ;;  %v1128_v20 = vadd.f32 %v1709_v33, %v1127_v52  ;;  %v1092_v39 = vadd.f32 %v1713_v0, %v1091_v18 }
 0x185   : > { %v1721_v10 = vpop.eup %1720  ;;  %v1202_v62 = vadd.f32 %v1711_v60, %v1201_v37  ;;  %v1166_v11 = vadd.f32 %v1715_v53, %v1165_v28  ;;  %v2506_v60 = vld [vmem:[#allocation2_spill] sm:$0xff]  ;;  %vm1244_vm1 = vcmp.lt.s32.totalorder %v2507_v8, 512 }
 0x186   : > { %v1723_v47 = vpop.eup %1722  ;;  %v1129_v19 = vadd.f32 %v1717_v27, %v1128_v20  ;;  %v1093_v14 = vadd.f32 %v1721_v10, %v1092_v39  ;;  %v1223_v61 = vsub.s32 %v1220_v63, %v2506_v60  ;;  %v1063_v27 = vld [vmem:[%s1832_s26] sm:$0xf] }
 0x187   : > { %v1725_v54 = vpop.eup %1724  ;;  %v1203_v17 = vadd.f32 %v1719_v55, %v1202_v62  ;;  %v1167_v24 = vadd.f32 %v1723_v47, %v1166_v11 }
 0x188   : > { %v1727_v6 = vpop.eup %1726  ;;  %v1130_v42 = vadd.f32 %v1725_v54, %v1129_v19 }
 0x189   : > { %v1729_v3 = vpop.eup %1728  ;;  %v1204_v57 = vadd.f32 %v1727_v6, %v1203_v17 }
 0x18a   : > { %v1731_v12 = vpop.eup %1730  ;;  %v1094_v1 = vadd.f32 %v1729_v3, %v1093_v14 }
 0x18b   : > { %v1733_v38 = vpop.eup %1732  ;;  %v1168_v16 = vadd.f32 %v1731_v12, %v1167_v24 }
 0x18c   : > { %v1735_v22 = vpop.eup %1734  ;;  %v1095_v51 = vrot.slane %v1094_v1, 4  ;;  %v1131_v2 = vadd.f32 %v1733_v38, %v1130_v42 }
 0x18d   : > { %v1169_v4 = vrot.slane %v1168_v16, 4  ;;  %v1205_v21 = vadd.f32 %v1735_v22, %v1204_v57 }
 0x18e   : > { %v1096_v36 = vadd.f32 %v1095_v51, %v1094_v1  ;;  %v1132_v49 = vrot.slane %v1131_v2, 4 }
 0x18f   : > { %v1170_v40 = vadd.f32 %v1169_v4, %v1168_v16  ;;  %v1206_v32 = vrot.slane %v1205_v21, 4 }
 0x190   : > { %v1097_v41 = vrot.slane %v1096_v36, 2  ;;  %v1133_v26 = vadd.f32 %v1132_v49, %v1131_v2 }
 0x191   : > { %v1171_v56 = vrot.slane %v1170_v40, 2  ;;  %v1207_v25 = vadd.f32 %v1206_v32, %v1205_v21 }
 0x192   : > { %v1098_v30 = vadd.f32 %v1097_v41, %v1096_v36  ;;  %v1134_v44 = vrot.slane %v1133_v26, 2 }
 0x193   : > { %v1172_v35 = vadd.f32 %v1171_v56, %v1170_v40  ;;  %v1208_v58 = vrot.slane %v1207_v25, 2 }
 0x194   : > { %v1099_v34 = vrot.slane %v1098_v30, 1  ;;  %v1135_v59 = vadd.f32 %v1134_v44, %v1133_v26 }
 0x195   : > { %v1173_v7 = vrot.slane %v1172_v35, 1  ;;  %v1209_v45 = vadd.f32 %v1208_v58, %v1207_v25 }
 0x196   : > { %v1136_v15 = vrot.slane %v1135_v59, 1  ;;  %v1100_v13 = vadd.f32 %v1099_v34, %v1098_v30 }
 0x197   : > { %v1210_v33 = vrot.slane %v1209_v45, 1  ;;  %v1174_v29 = vadd.f32 %v1173_v7, %v1172_v35 }
 0x198   : > { %v1137_v48 = vadd.f32 %v1136_v15, %v1135_v59 }
 0x199   : > { %v1211_v0 = vadd.f32 %v1210_v33, %v1209_v45 }
 0x19a   : > { %v1216_v46 = vcombine.low %v1100_v13, %v1137_v48 }
 0x19b   : > { %v1217_v50 = vcombine.low %v1174_v29, %v1211_v0 }
 0x19c   : > { %v1224_v53 = vrot.slane %v1216_v46, %v1223_v61 }
 0x19d   : > { %v1231_v43 = vrot.slane %v1217_v50, %v1223_v61 }
 0x19f   : > { %v1232_v9 = vcombine.low %v1224_v53, %v1231_v43 }
 0x1a1   : > { %v1239_v31 = vrot.slane %v1232_v9, %v1223_v61 }
 0x1a3   : > { %v1241_v55 = vadd.f32 %v1239_v31, %v1063_v27 }
 0x1a5   : > { %1246 = vst.msk [vmem:[%s1832_s26] sm:$0xf] %vm1244_vm1, %v1241_v55 }
 0x1a6 PF: > { %s13_s16 = sadd.s32 1, %s1774_s16   ;;  %s2508_s12 = smov %s1766_s14 }
 0x1a7   : > { %p10_p8 = scmp.ge.s32.totalorder %s13_s16, 6   ;;  %s2509_s13 = smov %s1770_s15 }
 0x1a8   : > { %s2510_s14 = smov %s2513_s17  ;;  %s2511_s15 = smov %s2517_s18 }
 0x1a9   :  { %12 = sbr.rel (!%p10_p8) target bundleno = 3 (0x3), region = 66 }

</bundles_post_ra>
